<compile_context>
chip_gen: v5e
topology: v5e:2x2
jax: 0.10.0
libtpu: 0.0.40
codegen_flags: <defaults>
</compile_context>

<pallas_src>
import functools

import jax
import jax.numpy as jnp
from jax.experimental import pallas as pl
from jax.experimental.pallas import tpu as pltpu


# ---------------------------------------------------------------------------
# Fused kernel: all per-label DeformNet + RefNet MLPs + blend reduction,
# looped over labels inside a single grid step.  grid = (B, N // TM).
# ---------------------------------------------------------------------------
def dmm_fused_kernel(has_smem,        # SMEM [G*B] int32 (scalar prefetch): has_this_tooth
                     coords_ref,      # [8, TM]   rows 0..2 = xyz, row 3 = 1, rows 4..7 = 0
                     bias1_ref,       # [G, H, 1] emb @ W1e + b1 for (g, this b)
                     w1_ref,          # [G, 2H, 8] rows 0:H = [w1c|0|0..], rows H:2H = [v1|c1|0..]
                     w2_ref,          # [G, 8, H]  DeformNet L2 weights (rows 5..7 zero)
                     b2_ref,          # [G, 8, 1]  DeformNet L2 bias     (rows 5..7 zero)
                     v1p_ref,         # [G, H, 8]  RefNet L1 weights     (cols 3..7 zero)
                     v2_ref,          # [G, 1, H]  RefNet L2 weights
                     c2_ref,          # [G, 1, 1]  RefNet L2 bias
                     sdf_ref,         # out [1, TM]  blended sdf
                     logits_ref,      # out [G, TM]  per-label blend logits
                     sum_w_ref):      # scratch [1, TM] blend-weight denominator
    b = pl.program_id(0)
    nb = pl.num_programs(0)
    n_labels = logits_ref.shape[0]
    H = v2_ref.shape[-1]

    coords = coords_ref[...]                              # [8, TM], stays live across labels

    sum_w_ref[...] = jnp.zeros_like(sum_w_ref)
    sdf_ref[...] = jnp.zeros_like(sdf_ref)

    @pl.loop(0, n_labels)
    def _per_label(g):
        # Layer 1 of BOTH nets in one MXU push: [2H,8] @ [8,TM].
        # base[0:H]  = w1c @ xyz            (DeformNet pre-bias)
        # base[H:2H] = v1  @ xyz + c1       (RefNet pre-activation at original coords)
        base = jnp.dot(w1_ref[g], coords, preferred_element_type=jnp.float32)   # [2H, TM]

        # DeformNet: bias1 = emb @ W1e + b1 precomputed per (g, b) in the glue.
        h = jnp.maximum(base[0:H, :] + bias1_ref[g], 0.0)                        # [H, TM]
        d_out = jnp.dot(w2_ref[g], h, preferred_element_type=jnp.float32) \
            + b2_ref[g]                                                          # [8, TM]

        # rows: 0..2 deformation, 3 correction, 4 blend logit, 5..7 zero-pad.
        logit = d_out[4:5, :]                                                    # [1, TM]
        logits_ref[pl.ds(g, 1), :] = logit     # needed for blend_loss regardless of `has`

        # Skip the RefNet + blend work entirely when this label is absent for
        # this batch element (its blend weight would be multiplied by 0 anyway).
        @pl.when(has_smem[g * nb + b] != 0)
        def _label_present():
            correction = d_out[3:4, :]                                           # [1, TM]
            # RefNet layer 1: v1 @ new_coords + c1
            #   = (v1 @ xyz + c1) + v1 @ deformation
            #   v1p has zero cols 3..7, so v1p @ d_out == v1 @ deformation.
            h2 = jnp.maximum(
                base[H:2 * H, :]
                + jnp.dot(v1p_ref[g], d_out, preferred_element_type=jnp.float32),
                0.0)                                                             # [H, TM]
            sdf = jnp.dot(v2_ref[g], h2, preferred_element_type=jnp.float32) \
                + c2_ref[g]                                                      # [1, TM]
            # has == 1 inside this branch, so blend weight is just sigmoid(logit).
            w_blend = 1.0 / (1.0 + jnp.exp(-logit))
            sum_w_ref[...] += w_blend
            sdf_ref[...] += (sdf + correction) * w_blend

    # L1-normalize over labels (weights >= 0); eps matches F.normalize(p=1).
    sdf_ref[...] = sdf_ref[...] / jnp.maximum(sum_w_ref[...], 1e-12)


# ---------------------------------------------------------------------------
# Wrapper around pallas_call
# ---------------------------------------------------------------------------
def dmm_fused(coords_pad, bias1_bg, has_flat, kp, *, tm):
    """coords_pad [B,8,N], bias1_bg [B,G,H,1], has_flat [G*B] int32, kp packed weights."""
    B, _, N = coords_pad.shape
    G = kp["w1aug"].shape[0]
    H = kp["v2"].shape[-1]
    assert N % tm == 0 and tm % 128 == 0, "tm must divide N and be a multiple of 128"
    nt = N // tm   # keep B * nt >= 2 so both v7x TensorCores stay busy

    sdf_b1n, logits_bgn = pl.pallas_call(
        dmm_fused_kernel,
        out_shape=(jax.ShapeDtypeStruct((B, 1, N), jnp.float32),
                   jax.ShapeDtypeStruct((B, G, N), jnp.float32)),
        grid_spec=pltpu.PrefetchScalarGridSpec(
            num_scalar_prefetch=1,                      # has_flat -> SMEM
            grid=(B, nt),
            in_specs=[
                # per-(b, t) point tile
                pl.BlockSpec((None, 8, tm), lambda b, t, has: (b, 0, t)),        # coords_pad
                # per-b (label, hidden) bias, re-fetched only when b changes
                pl.BlockSpec((None, G, H, 1), lambda b, t, has: (b, 0, 0, 0)),   # bias1_bg
                # label-indexed weights: constant index_map -> resident in VMEM
                pl.BlockSpec((G, 2 * H, 8), lambda b, t, has: (0, 0, 0)),        # w1aug
                pl.BlockSpec((G, 8, H), lambda b, t, has: (0, 0, 0)),            # w2p
                pl.BlockSpec((G, 8, 1), lambda b, t, has: (0, 0, 0)),            # b2p
                pl.BlockSpec((G, H, 8), lambda b, t, has: (0, 0, 0)),            # v1p
                pl.BlockSpec((G, 1, H), lambda b, t, has: (0, 0, 0)),            # v2
                pl.BlockSpec((G, 1, 1), lambda b, t, has: (0, 0, 0)),            # c2
            ],
            out_specs=(
                pl.BlockSpec((None, 1, tm), lambda b, t, has: (b, 0, t)),        # sdf
                pl.BlockSpec((None, G, tm), lambda b, t, has: (b, 0, t)),        # logits
            ),
            scratch_shapes=[pltpu.VMEM((1, tm), jnp.float32)]),
        compiler_params=pltpu.CompilerParams(
            dimension_semantics=("parallel", "parallel")),
    )(has_flat, coords_pad, bias1_bg,
      kp["w1aug"], kp["w2p"], kp["b2p"], kp["v1p"], kp["v2"], kp["c2k"])
    return sdf_b1n, logits_bgn


def pack_kernel_params(p):
    """Pack natural per-label params into the padded, MXU-friendly kernel layout."""
    G, H, _ = p["w1c"].shape
    f32 = jnp.float32
    z4 = jnp.zeros((G, H, 4), f32)
    top = jnp.concatenate([p["w1c"], jnp.zeros((G, H, 1), f32), z4], axis=-1)     # [G,H,8]
    bot = jnp.concatenate([p["v1"], p["c1"][..., None], z4], axis=-1)             # [G,H,8]
    w1aug = jnp.concatenate([top, bot], axis=1)                                   # [G,2H,8]
    w2p = jnp.concatenate([p["w2"], jnp.zeros((G, 3, H), f32)], axis=1)           # [G,8,H]
    b2p = jnp.concatenate([p["b2"], jnp.zeros((G, 3), f32)], axis=1)[..., None]   # [G,8,1]
    v1p = jnp.concatenate([p["v1"], jnp.zeros((G, H, 5), f32)], axis=-1)          # [G,H,8]
    return {"w1aug": w1aug, "w2p": w2p, "b2p": b2p, "v1p": v1p,
            "v2": p["v2"], "c2k": p["c2"][..., None]}


def bce_with_logits(x, z):
    # numerically-stable BCEWithLogits, elementwise
    return jnp.maximum(x, 0.0) - x * z + jnp.log1p(jnp.exp(-jnp.abs(x)))


@functools.partial(jax.jit, static_argnames=("label_vals", "tm"))
def dmm_forward(params, latent_tables, sdf_data, is_on_surf, normal, indices,
                label_vals, tm=512):
    """Reproduces the DMM forward hot path (see header for scope)."""
    del is_on_surf, normal  # used only by the autograd losses (TODO above)
    B, N, _ = sdf_data.shape
    M = B * N
    G = len(label_vals)

    coords = sdf_data[..., :3].astype(jnp.float32)               # [B, N, 3]
    label_ids = sdf_data[..., 4]                                  # [B, N] (float)

    # coords padded to 8 rows: xyz, ones (folds RefNet c1 into the MXU dot), zeros.
    coords_T = jnp.transpose(coords, (0, 2, 1))                   # [B, 3, N]
    coords_pad = jnp.concatenate(
        [coords_T, jnp.ones((B, 1, N), jnp.float32),
         jnp.zeros((B, 4, N), jnp.float32)], axis=1)              # [B, 8, N]

    # embedding lookup + fold (emb @ W1e + b1) into a per-(batch,label) bias
    emb = latent_tables[:, indices, :]                            # [G, B, L]
    bias1 = jnp.einsum("gbl,glh->gbh", emb, params["w1e"]) \
        + params["b1"][:, None, :]                                # [G, B, H]
    bias1_bg = jnp.transpose(bias1, (1, 0, 2))[..., None]         # [B, G, H, 1]

    labels_arr = jnp.asarray(label_vals, jnp.float32)             # [G]
    has = jnp.any(label_ids[None, :, :] == labels_arr[:, None, None], axis=-1)   # [G, B]
    has_flat = has.astype(jnp.int32).reshape(G * B)               # kernel index = g*B + b

    kp = pack_kernel_params(params)

    # --- fused Pallas hot path: all per-label MLPs + blend reduction ---
    sdf_b1n, logits_bgn = dmm_fused(coords_pad, bias1_bg, has_flat, kp, tm=tm)
    sdf_final = jnp.transpose(sdf_b1n, (0, 2, 1))                 # [B, N, 1]
    logits = jnp.transpose(logits_bgn, (1, 0, 2)).reshape(G, M)   # [G, M]

    # --- losses (glue) ---
    # NOTE: averaged over all G configured labels (reference averages over the
    # labels present in the batch; identical when every label appears).
    embedding_reg_loss = jnp.sum(jnp.mean(emb ** 2, axis=(1, 2)) * 1e6) / G

    ids_flat = label_ids.reshape(M)
    surf_mask = (ids_flat != -1.0).astype(jnp.float32)
    n_surf = jnp.maximum(jnp.sum(surf_mask), 1.0)
    seg = (ids_flat[None, :] == labels_arr[:, None]).astype(jnp.float32)   # [G, M]
    elem = bce_with_logits(logits, seg)
    blend_loss = jnp.sum(jnp.sum(elem * surf_mask[None, :], axis=-1) / n_surf * 100.0) / G

    # TODO(synk): sep_loss, center_loss and overall_sdf_normal_loss (autograd
    # w.r.t. coords + undefined helpers) are omitted; treated as 0 here.
    sep_loss = jnp.float32(0.0)
    center_loss = jnp.float32(0.0)
    overall_loss = jnp.float32(0.0)

    train_loss = (0.1 * overall_loss + blend_loss + embedding_reg_loss
                  + sep_loss + center_loss)
    return sdf_final, train_loss, blend_loss, embedding_reg_loss


def init_params(key, G, L, H):
    ks = jax.random.split(key, 9)

    def lin(k, shape, scale):
        return jax.random.normal(k, shape, jnp.float32) * scale

    return {
        "w1c": lin(ks[0], (G, H, 3), 1.0 / jnp.sqrt(3.0 + L)),   # DeformNet L1 coord weights
        "w1e": lin(ks[1], (G, L, H), 1.0 / jnp.sqrt(3.0 + L)),   # DeformNet L1 embedding weights
        "b1":  lin(ks[2], (G, H), 0.01),
        "w2":  lin(ks[3], (G, 5, H), 1.0 / jnp.sqrt(float(H))),  # DeformNet L2
        "b2":  lin(ks[4], (G, 5), 0.01),
        "v1":  lin(ks[5], (G, H, 3), 1.0 / jnp.sqrt(3.0)),       # RefNet L1
        "c1":  lin(ks[6], (G, H), 0.01),
        "v2":  lin(ks[7], (G, 1, H), 1.0 / jnp.sqrt(float(H))),  # RefNet L2
        "c2":  lin(ks[8], (G, 1), 0.01),
    }


if __name__ == "__main__":
    key = jax.random.PRNGKey(0)
    B, N, L, H = 2, 1024, 32, 64
    TM = 512                          # B * (N // TM) = 4 parallel grid steps
    label_vals = (0, 1, 2)            # gum (0) + two teeth
    G = len(label_vals)
    num_scenes = 4

    k1, k2, k3, k4, k5, k6 = jax.random.split(key, 6)

    # sdf_data: [..., 0:3]=coords, [..., 3]=gt sdf, [..., 4]=label id
    coords = jax.random.uniform(k1, (B, N, 3), jnp.float32, -1.0, 1.0)
    gt_sdf = jax.random.uniform(k2, (B, N, 1), jnp.float32, -0.1, 0.1)
    label_ids = jax.random.randint(k3, (B, N), -1, 3).astype(jnp.float32)  # in {-1,0,1,2}
    sdf_data = jnp.concatenate([coords, gt_sdf, label_ids[..., None]], axis=-1)

    is_on_surf = (label_ids != -1.0)
    normal = jax.random.normal(k4, (B, N, 3), jnp.float32)
    indices = jnp.array([0, 1], dtype=jnp.int32)

    latent_tables = jax.random.normal(k5, (G, num_scenes, L), jnp.float32) * 0.01
    params = init_params(k6, G, L, H)

    sdf_final, train_loss, blend_loss, emb_loss = dmm_forward(
        params, latent_tables, sdf_data, is_on_surf, normal, indices,
        label_vals, tm=TM)
    jax.block_until_ready((sdf_final, train_loss))

    assert sdf_final.shape == (B, N, 1)
    assert bool(jnp.all(jnp.isfinite(sdf_final))) and bool(jnp.isfinite(train_loss))
    print("KERNEL_OK")
</pallas_src>

<mosaic_0001>
module attributes {stable_mosaic.version = 11 : i64} {
  func.func @dmm_fused_kernel(%arg0: i32, %arg1: i32, %arg2: memref<6xi32, #tpu.memory_space<smem>>, %arg3: memref<1x8x512xf32, #tpu.memory_space<vmem>>, %arg4: memref<1x3x64x1xf32, #tpu.memory_space<vmem>>, %arg5: memref<3x128x8xf32, #tpu.memory_space<vmem>>, %arg6: memref<3x8x64xf32, #tpu.memory_space<vmem>>, %arg7: memref<3x8x1xf32, #tpu.memory_space<vmem>>, %arg8: memref<3x64x8xf32, #tpu.memory_space<vmem>>, %arg9: memref<3x1x64xf32, #tpu.memory_space<vmem>>, %arg10: memref<3x1x1xf32, #tpu.memory_space<vmem>>, %arg11: memref<1x1x512xf32, #tpu.memory_space<vmem>>, %arg12: memref<1x3x512xf32, #tpu.memory_space<vmem>>, %arg13: memref<1x512xf32, #tpu.memory_space<vmem>>) attributes {dimension_semantics = [#tpu.dimension_semantics<parallel>, #tpu.dimension_semantics<parallel>], iteration_bounds = array<i64: 2, 2>, scalar_prefetch = 1 : i64, scratch_operands = 1 : i64, tpu.core_type = #tpu.core_type<tc>, window_params = [{transform_indices = @transform_0, window_bounds = array<i64: 1, 8, 512>}, {transform_indices = @transform_1, window_bounds = array<i64: 1, 3, 64, 1>}, {pipeline_mode = #tpu.pipeline_mode<synchronous>, transform_indices = @transform_2, window_bounds = array<i64: 3, 128, 8>}, {pipeline_mode = #tpu.pipeline_mode<synchronous>, transform_indices = @transform_3, window_bounds = array<i64: 3, 8, 64>}, {pipeline_mode = #tpu.pipeline_mode<synchronous>, transform_indices = @transform_4, window_bounds = array<i64: 3, 8, 1>}, {pipeline_mode = #tpu.pipeline_mode<synchronous>, transform_indices = @transform_5, window_bounds = array<i64: 3, 64, 8>}, {pipeline_mode = #tpu.pipeline_mode<synchronous>, transform_indices = @transform_6, window_bounds = array<i64: 3, 1, 64>}, {pipeline_mode = #tpu.pipeline_mode<synchronous>, transform_indices = @transform_7, window_bounds = array<i64: 3, 1, 1>}, {transform_indices = @transform_8, window_bounds = array<i64: 1, 1, 512>}, {transform_indices = @transform_9, window_bounds = array<i64: 1, 3, 512>}]} {
    %c0 = arith.constant 0 : index
    %c0_0 = arith.constant 0 : index
    %c0_1 = arith.constant 0 : index
    %0 = vector.load %arg3[%c0, %c0_0, %c0_1] : memref<1x8x512xf32, #tpu.memory_space<vmem>>, vector<1x8x512xf32>
    %1 = vector.shape_cast %0 : vector<1x8x512xf32> to vector<8x512xf32>
    %cst = arith.constant 0.000000e+00 : f32
    %2 = vector.broadcast %cst : f32 to vector<1x512xf32>
    %c0_2 = arith.constant 0 : index
    %c0_3 = arith.constant 0 : index
    %3 = vector.load %arg13[%c0_2, %c0_3] : memref<1x512xf32, #tpu.memory_space<vmem>>, vector<1x512xf32>
    tpu.vector_store %arg13[%c0_2, %c0_3], %2 {strides = array<i32>} : memref<1x512xf32, #tpu.memory_space<vmem>>, vector<1x512xf32>,
    %cst_4 = arith.constant 0.000000e+00 : f32
    %4 = vector.broadcast %cst_4 : f32 to vector<1x512xf32>
    %c0_5 = arith.constant 0 : index
    %c0_6 = arith.constant 0 : index
    %c0_7 = arith.constant 0 : index
    %5 = vector.load %arg11[%c0_5, %c0_6, %c0_7] : memref<1x1x512xf32, #tpu.memory_space<vmem>>, vector<1x1x512xf32>
    %6 = vector.shape_cast %5 : vector<1x1x512xf32> to vector<1x512xf32>
    %7 = vector.shape_cast %4 : vector<1x512xf32> to vector<1x1x512xf32>
    tpu.vector_store %arg11[%c0_5, %c0_6, %c0_7], %7 {strides = array<i32>} : memref<1x1x512xf32, #tpu.memory_space<vmem>>, vector<1x1x512xf32>,
    %c0_i32 = arith.constant 0 : i32
    %c3_i32 = arith.constant 3 : i32
    %8 = arith.addi %c0_i32, %c3_i32 : i32
    %c1_i32 = arith.constant 1 : i32
    scf.for %arg14 = %c0_i32 to %8 step %c1_i32  : i32 {
      %c1_i32_18 = arith.constant 1 : i32
      %18 = arith.muli %arg14, %c1_i32_18 : i32
      %c0_i32_19 = arith.constant 0 : i32
      %19 = arith.addi %c0_i32_19, %18 : i32
      %20 = arith.index_cast %19 : i32 to index
      %c0_20 = arith.constant 0 : index
      %c0_21 = arith.constant 0 : index
      %21 = vector.load %arg5[%20, %c0_20, %c0_21] : memref<3x128x8xf32, #tpu.memory_space<vmem>>, vector<1x128x8xf32>
      %22 = vector.shape_cast %21 : vector<1x128x8xf32> to vector<128x8xf32>
      %cst_22 = arith.constant dense<0.000000e+00> : vector<128x512xf32>
      %23 = tpu.matmul %22, %1, %cst_22 {dimension_numbers = #tpu.dot_dimension_numbers<[1], [0], [0], [1], [0, 0, 1, 1], [], []>} : vector<128x8xf32>, vector<8x512xf32>, vector<128x512xf32> -> vector<128x512xf32>
      %24 = vector.extract_strided_slice %23 {offsets = [0, 0], sizes = [64, 512], strides = [1, 1]} : vector<128x512xf32> to vector<64x512xf32>
      %c0_23 = arith.constant 0 : index
      %25 = arith.index_cast %19 : i32 to index
      %c0_24 = arith.constant 0 : index
      %c0_25 = arith.constant 0 : index
      %26 = vector.load %arg4[%c0_23, %25, %c0_24, %c0_25] : memref<1x3x64x1xf32, #tpu.memory_space<vmem>>, vector<1x1x64x1xf32>
      %27 = vector.shape_cast %26 : vector<1x1x64x1xf32> to vector<64x1xf32>
      %28 = vector.broadcast %27 : vector<64x1xf32> to vector<64x512xf32>
      %29 = arith.addf %24, %28 : vector<64x512xf32>
      %cst_26 = arith.constant 0.000000e+00 : f32
      %30 = vector.broadcast %cst_26 : f32 to vector<64x512xf32>
      %31 = arith.maximumf %29, %30 : vector<64x512xf32>
      %32 = arith.index_cast %19 : i32 to index
      %c0_27 = arith.constant 0 : index
      %c0_28 = arith.constant 0 : index
      %33 = vector.load %arg6[%32, %c0_27, %c0_28] : memref<3x8x64xf32, #tpu.memory_space<vmem>>, vector<1x8x64xf32>
      %34 = vector.shape_cast %33 : vector<1x8x64xf32> to vector<8x64xf32>
      %cst_29 = arith.constant dense<0.000000e+00> : vector<8x512xf32>
      %35 = tpu.matmul %34, %31, %cst_29 {dimension_numbers = #tpu.dot_dimension_numbers<[1], [0], [0], [1], [0, 0, 1, 1], [], []>} : vector<8x64xf32>, vector<64x512xf32>, vector<8x512xf32> -> vector<8x512xf32>
      %36 = arith.index_cast %19 : i32 to index
      %c0_30 = arith.constant 0 : index
      %c0_31 = arith.constant 0 : index
      %37 = vector.load %arg7[%36, %c0_30, %c0_31] : memref<3x8x1xf32, #tpu.memory_space<vmem>>, vector<1x8x1xf32>
      %38 = vector.shape_cast %37 : vector<1x8x1xf32> to vector<8x1xf32>
      %39 = vector.broadcast %38 : vector<8x1xf32> to vector<8x512xf32>
      %40 = arith.addf %35, %39 : vector<8x512xf32>
      %41 = vector.extract_strided_slice %40 {offsets = [4, 0], sizes = [1, 512], strides = [1, 1]} : vector<8x512xf32> to vector<1x512xf32>
      %c0_32 = arith.constant 0 : index
      %42 = arith.index_cast %19 : i32 to index
      %c0_33 = arith.constant 0 : index
      %43 = vector.load %arg12[%c0_32, %42, %c0_33] : memref<1x3x512xf32, #tpu.memory_space<vmem>>, vector<1x1x512xf32>
      %44 = vector.shape_cast %43 : vector<1x1x512xf32> to vector<1x512xf32>
      %45 = vector.shape_cast %41 : vector<1x512xf32> to vector<1x1x512xf32>
      tpu.vector_store %arg12[%c0_32, %42, %c0_33], %45 {strides = array<i32>} : memref<1x3x512xf32, #tpu.memory_space<vmem>>, vector<1x1x512xf32>,
      %c2_i32 = arith.constant 2 : i32
      %46 = arith.muli %19, %c2_i32 : i32
      %47 = arith.addi %46, %arg0 : i32
      %48 = arith.index_cast %47 : i32 to index
      %49 = memref.load %arg2[%48] : memref<6xi32, #tpu.memory_space<smem>>
      %c0_i32_34 = arith.constant 0 : i32
      %50 = arith.cmpi ne, %49, %c0_i32_34 : i32
      %51 = arith.extui %50 : i1 to i32
      %c0_i32_35 = arith.constant 0 : i32
      %52 = arith.cmpi ne, %51, %c0_i32_35 : i32
      scf.if %52 {
        %53 = vector.extract_strided_slice %40 {offsets = [3, 0], sizes = [1, 512], strides = [1, 1]} : vector<8x512xf32> to vector<1x512xf32>
        %54 = vector.extract_strided_slice %23 {offsets = [64, 0], sizes = [64, 512], strides = [1, 1]} : vector<128x512xf32> to vector<64x512xf32>
        %55 = arith.index_cast %19 : i32 to index
        %c0_36 = arith.constant 0 : index
        %c0_37 = arith.constant 0 : index
        %56 = vector.load %arg8[%55, %c0_36, %c0_37] : memref<3x64x8xf32, #tpu.memory_space<vmem>>, vector<1x64x8xf32>
        %57 = vector.shape_cast %56 : vector<1x64x8xf32> to vector<64x8xf32>
        %cst_38 = arith.constant dense<0.000000e+00> : vector<64x512xf32>
        %58 = tpu.matmul %57, %40, %cst_38 {dimension_numbers = #tpu.dot_dimension_numbers<[1], [0], [0], [1], [0, 0, 1, 1], [], []>} : vector<64x8xf32>, vector<8x512xf32>, vector<64x512xf32> -> vector<64x512xf32>
        %59 = arith.addf %54, %58 : vector<64x512xf32>
        %cst_39 = arith.constant 0.000000e+00 : f32
        %60 = vector.broadcast %cst_39 : f32 to vector<64x512xf32>
        %61 = arith.maximumf %59, %60 : vector<64x512xf32>
        %62 = arith.index_cast %19 : i32 to index
        %c0_40 = arith.constant 0 : index
        %c0_41 = arith.constant 0 : index
        %63 = vector.load %arg9[%62, %c0_40, %c0_41] : memref<3x1x64xf32, #tpu.memory_space<vmem>>, vector<1x1x64xf32>
        %64 = vector.shape_cast %63 : vector<1x1x64xf32> to vector<1x64xf32>
        %cst_42 = arith.constant dense<0.000000e+00> : vector<1x512xf32>
        %65 = tpu.matmul %64, %61, %cst_42 {dimension_numbers = #tpu.dot_dimension_numbers<[1], [0], [0], [1], [0, 0, 1, 1], [], []>} : vector<1x64xf32>, vector<64x512xf32>, vector<1x512xf32> -> vector<1x512xf32>
        %66 = arith.index_cast %19 : i32 to index
        %c0_43 = arith.constant 0 : index
        %c0_44 = arith.constant 0 : index
        %67 = vector.load %arg10[%66, %c0_43, %c0_44] : memref<3x1x1xf32, #tpu.memory_space<vmem>>, vector<1x1x1xf32>
        %68 = vector.shape_cast %67 : vector<1x1x1xf32> to vector<1x1xf32>
        %69 = vector.broadcast %68 : vector<1x1xf32> to vector<1x512xf32>
        %70 = arith.addf %65, %69 : vector<1x512xf32>
        %cst_45 = arith.constant 0.000000e+00 : f32
        %71 = vector.broadcast %cst_45 : f32 to vector<1x512xf32>
        %72 = arith.subf %71, %41 : vector<1x512xf32>
        %73 = math.exp %72 : vector<1x512xf32>
        %cst_46 = arith.constant 1.000000e+00 : f32
        %74 = vector.broadcast %cst_46 : f32 to vector<1x512xf32>
        %75 = arith.addf %74, %73 : vector<1x512xf32>
        %cst_47 = arith.constant 1.000000e+00 : f32
        %76 = vector.broadcast %cst_47 : f32 to vector<1x512xf32>
        %77 = arith.divf %76, %75 : vector<1x512xf32>
        %c0_48 = arith.constant 0 : index
        %c0_49 = arith.constant 0 : index
        %78 = vector.load %arg13[%c0_48, %c0_49] : memref<1x512xf32, #tpu.memory_space<vmem>>, vector<1x512xf32>
        %79 = arith.addf %78, %77 : vector<1x512xf32>
        %c0_50 = arith.constant 0 : index
        %c0_51 = arith.constant 0 : index
        %80 = vector.load %arg13[%c0_50, %c0_51] : memref<1x512xf32, #tpu.memory_space<vmem>>, vector<1x512xf32>
        tpu.vector_store %arg13[%c0_50, %c0_51], %79 {strides = array<i32>} : memref<1x512xf32, #tpu.memory_space<vmem>>, vector<1x512xf32>,
        %c0_52 = arith.constant 0 : index
        %c0_53 = arith.constant 0 : index
        %c0_54 = arith.constant 0 : index
        %81 = vector.load %arg11[%c0_52, %c0_53, %c0_54] : memref<1x1x512xf32, #tpu.memory_space<vmem>>, vector<1x1x512xf32>
        %82 = vector.shape_cast %81 : vector<1x1x512xf32> to vector<1x512xf32>
        %83 = arith.addf %70, %53 : vector<1x512xf32>
        %84 = arith.mulf %83, %77 : vector<1x512xf32>
        %85 = arith.addf %82, %84 : vector<1x512xf32>
        %c0_55 = arith.constant 0 : index
        %c0_56 = arith.constant 0 : index
        %c0_57 = arith.constant 0 : index
        %86 = vector.load %arg11[%c0_55, %c0_56, %c0_57] : memref<1x1x512xf32, #tpu.memory_space<vmem>>, vector<1x1x512xf32>
        %87 = vector.shape_cast %86 : vector<1x1x512xf32> to vector<1x512xf32>
        %88 = vector.shape_cast %85 : vector<1x512xf32> to vector<1x1x512xf32>
        tpu.vector_store %arg11[%c0_55, %c0_56, %c0_57], %88 {strides = array<i32>} : memref<1x1x512xf32, #tpu.memory_space<vmem>>, vector<1x1x512xf32>,
      } else {
      }
    }
    %c3_i32_8 = arith.constant 3 : i32
    %c0_9 = arith.constant 0 : index
    %c0_10 = arith.constant 0 : index
    %c0_11 = arith.constant 0 : index
    %9 = vector.load %arg11[%c0_9, %c0_10, %c0_11] : memref<1x1x512xf32, #tpu.memory_space<vmem>>, vector<1x1x512xf32>
    %10 = vector.shape_cast %9 : vector<1x1x512xf32> to vector<1x512xf32>
    %c0_12 = arith.constant 0 : index
    %c0_13 = arith.constant 0 : index
    %11 = vector.load %arg13[%c0_12, %c0_13] : memref<1x512xf32, #tpu.memory_space<vmem>>, vector<1x512xf32>
    %cst_14 = arith.constant 9.99999996E-13 : f32
    %12 = vector.broadcast %cst_14 : f32 to vector<1x512xf32>
    %13 = arith.maximumf %11, %12 : vector<1x512xf32>
    %14 = arith.divf %10, %13 : vector<1x512xf32>
    %c0_15 = arith.constant 0 : index
    %c0_16 = arith.constant 0 : index
    %c0_17 = arith.constant 0 : index
    %15 = vector.load %arg11[%c0_15, %c0_16, %c0_17] : memref<1x1x512xf32, #tpu.memory_space<vmem>>, vector<1x1x512xf32>
    %16 = vector.shape_cast %15 : vector<1x1x512xf32> to vector<1x512xf32>
    %17 = vector.shape_cast %14 : vector<1x512xf32> to vector<1x1x512xf32>
    tpu.vector_store %arg11[%c0_15, %c0_16, %c0_17], %17 {strides = array<i32>} : memref<1x1x512xf32, #tpu.memory_space<vmem>>, vector<1x1x512xf32>,
    return
  }
  func.func @transform_0(%arg0: i32, %arg1: i32, %arg2: memref<6xi32, #tpu.memory_space<smem>>) -> (i32, i32, i32) {
    %c0_i32 = arith.constant 0 : i32
    %c0_i32_0 = arith.constant 0 : i32
    return %arg0, %c0_i32, %arg1 : i32, i32, i32
  }
  func.func @transform_1(%arg0: i32, %arg1: i32, %arg2: memref<6xi32, #tpu.memory_space<smem>>) -> (i32, i32, i32, i32) {
    %c0_i32 = arith.constant 0 : i32
    %c0_i32_0 = arith.constant 0 : i32
    %c0_i32_1 = arith.constant 0 : i32
    %c0_i32_2 = arith.constant 0 : i32
    return %arg0, %c0_i32, %c0_i32_0, %c0_i32_1 : i32, i32, i32, i32
  }
  func.func @transform_2(%arg0: i32, %arg1: i32, %arg2: memref<6xi32, #tpu.memory_space<smem>>) -> (i32, i32, i32) {
    %c0_i32 = arith.constant 0 : i32
    %c0_i32_0 = arith.constant 0 : i32
    %c0_i32_1 = arith.constant 0 : i32
    %c0_i32_2 = arith.constant 0 : i32
    return %c0_i32, %c0_i32_0, %c0_i32_1 : i32, i32, i32
  }
  func.func @transform_3(%arg0: i32, %arg1: i32, %arg2: memref<6xi32, #tpu.memory_space<smem>>) -> (i32, i32, i32) {
    %c0_i32 = arith.constant 0 : i32
    %c0_i32_0 = arith.constant 0 : i32
    %c0_i32_1 = arith.constant 0 : i32
    %c0_i32_2 = arith.constant 0 : i32
    return %c0_i32, %c0_i32_0, %c0_i32_1 : i32, i32, i32
  }
  func.func @transform_4(%arg0: i32, %arg1: i32, %arg2: memref<6xi32, #tpu.memory_space<smem>>) -> (i32, i32, i32) {
    %c0_i32 = arith.constant 0 : i32
    %c0_i32_0 = arith.constant 0 : i32
    %c0_i32_1 = arith.constant 0 : i32
    %c0_i32_2 = arith.constant 0 : i32
    return %c0_i32, %c0_i32_0, %c0_i32_1 : i32, i32, i32
  }
  func.func @transform_5(%arg0: i32, %arg1: i32, %arg2: memref<6xi32, #tpu.memory_space<smem>>) -> (i32, i32, i32) {
    %c0_i32 = arith.constant 0 : i32
    %c0_i32_0 = arith.constant 0 : i32
    %c0_i32_1 = arith.constant 0 : i32
    %c0_i32_2 = arith.constant 0 : i32
    return %c0_i32, %c0_i32_0, %c0_i32_1 : i32, i32, i32
  }
  func.func @transform_6(%arg0: i32, %arg1: i32, %arg2: memref<6xi32, #tpu.memory_space<smem>>) -> (i32, i32, i32) {
    %c0_i32 = arith.constant 0 : i32
    %c0_i32_0 = arith.constant 0 : i32
    %c0_i32_1 = arith.constant 0 : i32
    %c0_i32_2 = arith.constant 0 : i32
    return %c0_i32, %c0_i32_0, %c0_i32_1 : i32, i32, i32
  }
  func.func @transform_7(%arg0: i32, %arg1: i32, %arg2: memref<6xi32, #tpu.memory_space<smem>>) -> (i32, i32, i32) {
    %c0_i32 = arith.constant 0 : i32
    %c0_i32_0 = arith.constant 0 : i32
    %c0_i32_1 = arith.constant 0 : i32
    %c0_i32_2 = arith.constant 0 : i32
    return %c0_i32, %c0_i32_0, %c0_i32_1 : i32, i32, i32
  }
  func.func @transform_8(%arg0: i32, %arg1: i32, %arg2: memref<6xi32, #tpu.memory_space<smem>>) -> (i32, i32, i32) {
    %c0_i32 = arith.constant 0 : i32
    %c0_i32_0 = arith.constant 0 : i32
    return %arg0, %c0_i32, %arg1 : i32, i32, i32
  }
  func.func @transform_9(%arg0: i32, %arg1: i32, %arg2: memref<6xi32, #tpu.memory_space<smem>>) -> (i32, i32, i32) {
    %c0_i32 = arith.constant 0 : i32
    %c0_i32_0 = arith.constant 0 : i32
    return %arg0, %c0_i32, %arg1 : i32, i32, i32
  }
}

</mosaic_0001>

<bundles_post_ra>
// kernel: dmm_forward.1
= control target key start
LH: loop header
LB: loop body
LE: loop exit
PB: predicated region body
PF: predicated region fallthrough
CT: control target
= control target key end

     0   :  { %s2029_s16 = smov [#allocation4]   ;;  %s2663_s0 = inlined_call_operand.vmem [shape: s32[6], index: 0, kind: input, shape index: {}]   ;;  %s2664_s1 = inlined_call_operand.vmem [shape: f32[2,8,1024], index: 1, kind: input, shape index: {}]   ;;  %s2665_s2 = inlined_call_operand.vmem [shape: f32[2,3,64,1], index: 2, kind: input, shape index: {}]   ;;  %s2666_s3 = inlined_call_operand.vmem [shape: f32[3,128,8], index: 3, kind: input, shape index: {}]   ;;  %s2667_s4 = inlined_call_operand.vmem [shape: f32[3,8,64], index: 4, kind: input, shape index: {}]   ;;  %s2668_s5 = inlined_call_operand.vmem [shape: f32[3,8,1], index: 5, kind: input, shape index: {}]   ;;  %s2669_s6 = inlined_call_operand.vmem [shape: f32[3,64,8], index: 6, kind: input, shape index: {}]   ;;  %s2670_s7 = inlined_call_operand.vmem [shape: f32[3,1,64], index: 7, kind: input, shape index: {}]   ;;  %s2671_s8 = inlined_call_operand.vmem [shape: f32[3,1,1], index: 8, kind: input, shape index: {}]   ;;  %s2672_s9 = inlined_call_operand.hbm [shape: f32[2,1,1024], index: 9, kind: output, shape index: {0}]   ;;  %s2673_s10 = inlined_call_operand.vmem [shape: f32[2,3,1024], index: 10, kind: output, shape index: {1}]  }
   0x1   :  { %s17_s15 = sshll.u32 %s2663_s0, 4  ;;  %s18_s15 = int_to_ptr.vmem [resolvable:$true] %s17_s15 }
   0x2   :  { %20 = dma.vmem_to_smem %s18_s15, 16, %s2029_s16, [#allocation3] }
   0x3   :  { %1987 = dma.done.wait [#allocation3], 16 }
   0x4   :  { %1988 = vsyncadd [#allocation3], 4294967280 }
   0x5   :  { %23 = sfence }
   0x6   :  { %24 = vsyncpa [#allocation6], 0 }
   0x7   :  { %26 = vsyncpa [#allocation6 + $0x1], 0  ;;  %s2091_s17 = smov 0   ;;  %s2093_s18 = smov 0  }
   0x8   :  { %s2095_s19 = smov 0   ;;  %s2097_s20 = smov 0  }
   0x9   :  { %s2099_s21 = smov 0   ;;  %s2101_s22 = smov 0  }
   0xa   :  { %s2103_s0 = smov 0   ;;  %s2105_s23 = smov 0  }
   0xb LB: > { %2695 = sst [smem:[#allocation9_spill]] %s1995_s17  ;;  %s1675_s24 = sadd.s32 4294967295, %s2023_s23   ;;  %s2023_s23 = sphi %s2105_s23, %s32_s23   ;;  %s2019_s0 = sphi %s2103_s0, %s2754_s0   ;;  %s2015_s22 = sphi %s2101_s22, %s2753_s22   ;;  %s2011_s21 = sphi %s2099_s21, %s2752_s21   ;;  %s2007_s20 = sphi %s2097_s20, %s2751_s20   ;;  %s2003_s19 = sphi %s2095_s19, %s2750_s19   ;;  %s1999_s18 = sphi %s2093_s18, %s2756_s18   ;;  %s1995_s17 = sphi %s2091_s17, %s2755_s17  }
   0xc   : > { %2696 = sst [smem:[#allocation10_spill]] %s2003_s19  ;;  %s1676_s25 = sadd.s32 4294967294, %s2023_s23  }
   0xd   : > { %2697 = sst [smem:[#allocation11_spill]] %s2015_s22  ;;  %s41_s26 = sadd.s32 1, %s2015_s22 }
   0xe   : > { %2698 = sst [smem:[#allocation12_spill]] %s2019_s0  ;;  %p42_p0 = scmp.ge.s32.totalorder %s41_s26, 2 }
   0xf   : > { %2699 = sst [smem:[#allocation13_spill]] %s2023_s23  ;;  %s44_s27 = sadd.s32 1, %s2019_s0 }
  0x10   : > { %p243_p1 = scmp.ne.s32.totalorder %s2003_s19, %s1999_s18  ;;  %p244_p2 = scmp.eq.s32.totalorder %s1675_s24, 3 }
  0x11   : > { %s2758_s26 = smov (%p42_p0, %s41_s26), 0  ;;  %s2760_s27 = smov (!%p42_p0, %s44_s27), %s2019_s0 }
  0x12   : > { %2700 = sst [smem:[#allocation14_spill]] %s2758_s26  ;;  %s229_s28 = ssub.s32 %s2015_s22, %s2758_s26 }
  0x13   : > { %p2142_p3 = por %p244_p2, %p243_p1  ;;  %p46_p4 = scmp.ge.s32.totalorder %s2760_s27, 2 }
  0x14   : > { %p249_p5 = scmp.ne.s32.totalorder %s1999_s18, %s1995_s17  ;;  %p250_p6 = scmp.eq.s32.totalorder %s1676_s25, 3 }
  0x15   : > { %s2701_s29 = scalar_select %p2142_p3, 1, 0 }
  0x16   : > { %p1679_p7 = scmp.ge.s32.totalorder %s2023_s23, 1  ;;  %s2762_s27 = smov (%p46_p4, %s2760_s27), 0 }
  0x17   : > { %2702 = sst [smem:[#allocation15_spill]] %s2701_s29  ;;  %p2151_p8 = por %p250_p6, %p249_p5 }
  0x18   : > { %2703 = sst [smem:[#allocation16_spill]] %s2762_s27  ;;  %p335_p9 = scmp.lt.s32.totalorder %s2023_s23, 5 }
  0x19   : > { %s2704_s30 = scalar_select %p2151_p8, 1, 0 }
  0x1a   : > { %s228_s11 = ssub.s32 %s2019_s0, %s2762_s27  ;;  %s233_s12 = sadd.s32 1, %s2003_s19 }
  0x1b   : > { %2705 = sst [smem:[#allocation17_spill]] %s2704_s30  ;;  %s230_s13 = sor.u32 %s229_s28, %s228_s11 }
  0x1c   : > { %p336_p10 = pnand %p1679_p7, %p335_p9  ;;  %p231_p11 = scmp.eq.s32.totalorder %s230_s13, 0 }
  0x1e   : > { %s2160_s14 = scalar_select %p231_p11, %s2003_s19, %s233_s12  }
  0x1f   : > { %339 = sbr.rel (%p336_p10) target bundleno = 792 (0x318), region = 52 }
  0x20   : > { %2706 = sst [smem:[#allocation18_spill]] %s2160_s14 }
  0x24   : > { %s2163_s15 = sshll.u32 %s2007_s20, 2  ;;  %p390_p12 = scmp.lt.s32.totalorder %s2011_s21, 1  ;;  %v419_v0 = vlaneseq  ;;  %v2707_v1 = vmov 0  ;;  %v2030_v2 = vmov 0.0  }
  0x25   : > { %p392_p13 = scmp.lt.s32.totalorder %s2163_s15, 7  ;;  %s375_s16 = sand.u32 1, %s1999_s18  }
  0x26   : > { %s391_s24 = scalar_select %p390_p12, %s2011_s21, 1  ;;  %vm2169_vm0 = vcmp.lt.s32.totalorder %v419_v0, 512 }
  0x27   : > { %v2708_v1 = vsel %vm2169_vm0, 4294967295, %v2707_v1  ;;  %s393_s25 = scalar_select %p392_p13, %s2163_s15, 7  ;;  %423 = vst.msk [vmem:[#allocation2] sm:$0xf] %vm2169_vm0, %v2030_v2 }
  0x28   : > { %2709 = vst [vmem:[#allocation19_spill] sm:$0xff] %v2708_v1  ;;  %s1682_s28 = sshll.u32 %s391_s24, 3  ;;  %s1805_s11 = smul.u32 192, %s391_s24 }
  0x29   : > { %s395_s20 = sadd.s32 %s1682_s28, %s393_s25  ;;  %s1680_s12 = sshll.u32 %s375_s16, 2 }
  0x2a   : > { %s1683_s13 = sshll.u32 %s395_s20, 3  ;;  %s2181_s0 = scalar_lea.vmem %s2665_s2, %s1805_s11 }
  0x2b   : > { %s397_s19 = scalar_lea.vmem %s2664_s1, %s1683_s13  ;;  %s1687_s30 = sshll.u32 %s395_s20, 2 }
  0x2c   : > { %s2189_s29 = scalar_lea.vmem %s2673_s10, %s1687_s30  ;;  %v2191_v3 = vld [vmem:[%s397_s19] sm:$0xff]  ;;  %v2193_v4 = vld [vmem:[%s397_s19 + $0x8] sm:$0xff]  ;;  %v2195_v5 = vld [vmem:[%s397_s19 + $0x10] sm:$0xff]  ;;  %s2199_s26 = scalar_lea.vmem [#allocation5], %s1680_s12 }
  0x2d   : > { %2710 = vst [vmem:[#allocation20_spill] sm:$0xff] %v2191_v3  ;;  %v2197_v6 = vld [vmem:[%s397_s19 + $0x18] sm:$0xff]  ;;  %s2204_s22 = smov 0  }
  0x2e   : > { %2711 = vst [vmem:[#allocation21_spill] sm:$0xff] %v2193_v4 }
  0x2f   : > { %2712 = vst [vmem:[#allocation22_spill] sm:$0xff] %v2195_v5 }
  0x30   : > { %2713 = vst [vmem:[#allocation23_spill] sm:$0xff] %v2197_v6 }
  0x31   : > { %424 = vst.msk [vmem:[%s2199_s26] sm:$0xf] %vm2169_vm0, %v2030_v2 }
  0x32 LB: >> { %v2031_v7 = vmov 0   ;;  %s1688_s17 = sshll.u32 %s2027_s22, 7  ;;  %vm449_vm1 = vcmask 64512   ;;  %s1761_s19 = sshll.u32 %s2027_s22, 1  ;;  %vm882_vm2 = vcmask 523264   ;;  %s2027_s22 = sphi %s2204_s22, %s430_s22  }
  0x33   : >> { %1890 = vset.pattern.permute.xlu1 %v2031_v7  ;;  %1889 = vset.pattern.permute.xlu0 %v2031_v7  ;;  %s2218_s30 = scalar_lea.vmem %s2666_s3, %s1688_s17  ;;  %s987_s14 = sadd.s32 %s2011_s21, %s1761_s19 }
  0x34   : >> { %v2714_v3 = vld [vmem:[#allocation20_spill] sm:$0xff]  ;;  %1891 = vset.pattern.permute.xlu2 %v2031_v7  ;;  %s2222_s24 = sld [smem:[#allocation4 + %s987_s14]]  ;;  %s1753_s25 = sshll.u32 %s2027_s22, 6  ;;  %v434_v11 = vld [vmem:[%s2218_s30 + $0x8] sm:$0xff]  ;;  %v435_v14 = vld [vmem:[%s2218_s30 + $0x10] sm:$0xff] }
  0x35   : >> { %513 = vmatpush.msra.mxu0 %v2714_v3  ;;  %v2715_v4 = vld [vmem:[#allocation21_spill] sm:$0xff]  ;;  %s2230_s28 = scalar_lea.vmem %s2181_s0, %s1753_s25  ;;  %v436_v18 = vld [vmem:[%s2218_s30 + $0x18] sm:$0xff]  ;;  %v439_v22 = vld [vmem:[%s2218_s30 + $0x30] sm:$0xff]  ;;  %s1754_s11 = sshll.u32 %s2027_s22, 3 }
  0x36   : >> { %578 = vmatpush.msra.mxu1 %v2715_v4  ;;  %v2716_v5 = vld [vmem:[#allocation22_spill] sm:$0xff]  ;;  %v433_v8 = vld [vmem:[%s2218_s30] sm:$0xff]  ;;  %v767_v10 = vld [vmem:[%s2230_s28 + $0x38] sm:$0xff]  ;;  %s875_s13 = scalar_lea.vmem %s2668_s5, %s1754_s11  ;;  %s873_s23 = scalar_lea.vmem %s2667_s4, %s1754_s11 }
  0x37   : >> { %643 = vmatpush.msra.mxu2 %v2716_v5  ;;  %v2717_v6 = vld [vmem:[#allocation23_spill] sm:$0xff]  ;;  %1689 = vmatmul.msk.f32.vlgmr.msra.gmra.mxu0 %vm449_vm1, %v433_v8  ;;  %v765_v9 = vld [vmem:[%s2230_s28 + $0x28] sm:$0xff]  ;;  %v764_v12 = vld [vmem:[%s2230_s28 + $0x20] sm:$0xff]  ;;  %s977_s27 = sshra.s32 %s2027_s22, 2 }
  0x38   : >> { %708 = vmatpush.msra.mxu3 %v2717_v6  ;;  %1705 = vmatmul.msk.f32.vlgmr.msra.gmra.mxu1 %vm449_vm1, %v433_v8  ;;  %v766_v13 = vld [vmem:[%s2230_s28 + $0x30] sm:$0xff]  ;;  %v760_v15 = vld [vmem:[%s2230_s28] sm:$0xff]  ;;  %v761_v16 = vld [vmem:[%s2230_s28 + $0x8] sm:$0xff]  ;;  %s1804_s14 = sshll.u32 %s977_s27, 4 }
  0x39   : >> { %1721 = vmatmul.msk.f32.vlgmr.msra.gmra.mxu2 %vm449_vm1, %v433_v8  ;;  %1737 = vmatmul.msk.f32.vlgmr.msra.gmra.mxu3 %vm449_vm1, %v433_v8  ;;  %v763_v17 = vld [vmem:[%s2230_s28 + $0x18] sm:$0xff]  ;;  %v762_v19 = vld [vmem:[%s2230_s28 + $0x10] sm:$0xff]  ;;  %v437_v20 = vld [vmem:[%s2218_s30 + $0x20] sm:$0xff] }
  0x3a   : >> { %795 = vperm.xlu1 %1890, %v765_v9   ;;  %805 = vperm.xlu0 %1889, %v767_v10   ;;  %v438_v21 = vld [vmem:[%s2218_s30 + $0x28] sm:$0xff]  ;;  %v440_v23 = vld [vmem:[%s2218_s30 + $0x38] sm:$0xff]  ;;  %v876_v24 = vld [vmem:[%s875_s13] sm:$0xff]  ;;  %p1762_p0 = scmp.eq.s32.totalorder %s2222_s24, 0 }
  0x3b   : >> { %785 = vperm.xlu2 %1891, %v763_v17   ;;  %v441_v25 = vld [vmem:[%s2218_s30 + $0x40] sm:$0xff]  ;;  %v442_v26 = vld [vmem:[%s2218_s30 + $0x48] sm:$0xff]  ;;  %v443_v27 = vld [vmem:[%s2218_s30 + $0x50] sm:$0xff] }
  0x3c   : >> { %v444_v30 = vld [vmem:[%s2218_s30 + $0x58] sm:$0xff]  ;;  %v445_v35 = vld [vmem:[%s2218_s30 + $0x60] sm:$0xff]  ;;  %v446_v40 = vld [vmem:[%s2218_s30 + $0x68] sm:$0xff] }
  0x3d   : >> { %v447_v45 = vld [vmem:[%s2218_s30 + $0x70] sm:$0xff]  ;;  %v448_v50 = vld [vmem:[%s2218_s30 + $0x78] sm:$0xff]  ;;  %s980_s30 = sand.u32 3, %s2027_s22 }
  0x3e   : >> { %s983_s28 = sadd.s32 %s1804_s14, %s980_s30 }
  0x3f   : >> { %1690 = vmatmul.msk.f32.gmra.mxu0 %vm449_vm1, %v434_v11  ;;  %s984_s11 = scalar_lea.vmem %s2189_s29, %s983_s28 }
  0x40   : >> { %1706 = vmatmul.msk.f32.gmra.mxu1 %vm449_vm1, %v434_v11 }
  0x41   : >> { %1722 = vmatmul.msk.f32.gmra.mxu2 %vm449_vm1, %v434_v11  ;;  %1738 = vmatmul.msk.f32.gmra.mxu3 %vm449_vm1, %v434_v11 }
  0x42   : >> { %790 = vperm.xlu1 %1890, %v764_v12   ;;  %800 = vperm.xlu0 %1889, %v766_v13  }
  0x43   : >> { %780 = vperm.xlu2 %1891, %v762_v19  }
  0x47   : >> { %1691 = vmatmul.msk.f32.gmra.mxu0 %vm449_vm1, %v435_v14 }
  0x48   : >> { %1707 = vmatmul.msk.f32.gmra.mxu1 %vm449_vm1, %v435_v14 }
  0x49   : >> { %1723 = vmatmul.msk.f32.gmra.mxu2 %vm449_vm1, %v435_v14  ;;  %1739 = vmatmul.msk.f32.gmra.mxu3 %vm449_vm1, %v435_v14 }
  0x4a   : >> { %770 = vperm.xlu1 %1890, %v760_v15   ;;  %775 = vperm.xlu0 %1889, %v761_v16  }
  0x4b   : >> { %879 = vperm.xlu2 %1891, %v876_v24  }
  0x4f   : >> { %1692 = vmatmul.msk.f32.gmra.mxu0 %vm449_vm1, %v436_v18 }
  0x50   : >> { %1708 = vmatmul.msk.f32.gmra.mxu1 %vm449_vm1, %v436_v18 }
  0x51   : >> { %1724 = vmatmul.msk.f32.gmra.mxu2 %vm449_vm1, %v436_v18  ;;  %1740 = vmatmul.msk.f32.gmra.mxu3 %vm449_vm1, %v436_v18 }
  0x57   : >> { %1693 = vmatmul.msk.f32.gmra.mxu0 %vm449_vm1, %v437_v20 }
  0x58   : >> { %1709 = vmatmul.msk.f32.gmra.mxu1 %vm449_vm1, %v437_v20 }
  0x59   : >> { %1725 = vmatmul.msk.f32.gmra.mxu2 %vm449_vm1, %v437_v20  ;;  %1741 = vmatmul.msk.f32.gmra.mxu3 %vm449_vm1, %v437_v20 }
  0x5f   : >> { %1694 = vmatmul.msk.f32.gmra.mxu0 %vm449_vm1, %v438_v21 }
  0x60   : >> { %1710 = vmatmul.msk.f32.gmra.mxu1 %vm449_vm1, %v438_v21 }
  0x61   : >> { %1726 = vmatmul.msk.f32.gmra.mxu2 %vm449_vm1, %v438_v21  ;;  %1742 = vmatmul.msk.f32.gmra.mxu3 %vm449_vm1, %v438_v21 }
  0x67   : >> { %1695 = vmatmul.msk.f32.gmra.mxu0 %vm449_vm1, %v439_v22 }
  0x68   : >> { %1711 = vmatmul.msk.f32.gmra.mxu1 %vm449_vm1, %v439_v22 }
  0x69   : >> { %1727 = vmatmul.msk.f32.gmra.mxu2 %vm449_vm1, %v439_v22  ;;  %1743 = vmatmul.msk.f32.gmra.mxu3 %vm449_vm1, %v439_v22 }
  0x6f   : >> { %1696 = vmatmul.msk.f32.gmra.mxu0 %vm449_vm1, %v440_v23 }
  0x70   : >> { %1712 = vmatmul.msk.f32.gmra.mxu1 %vm449_vm1, %v440_v23 }
  0x71   : >> { %1728 = vmatmul.msk.f32.gmra.mxu2 %vm449_vm1, %v440_v23  ;;  %1744 = vmatmul.msk.f32.gmra.mxu3 %vm449_vm1, %v440_v23 }
  0x77   : >> { %1697 = vmatmul.msk.f32.gmra.mxu0 %vm449_vm1, %v441_v25 }
  0x78   : >> { %1713 = vmatmul.msk.f32.gmra.mxu1 %vm449_vm1, %v441_v25 }
  0x79   : >> { %1729 = vmatmul.msk.f32.gmra.mxu2 %vm449_vm1, %v441_v25  ;;  %1745 = vmatmul.msk.f32.gmra.mxu3 %vm449_vm1, %v441_v25 }
  0x7f   : >> { %1698 = vmatmul.msk.f32.gmra.mxu0 %vm449_vm1, %v442_v26 }
  0x80   : >> { %1714 = vmatmul.msk.f32.gmra.mxu1 %vm449_vm1, %v442_v26 }
  0x81   : >> { %1730 = vmatmul.msk.f32.gmra.mxu2 %vm449_vm1, %v442_v26  ;;  %1746 = vmatmul.msk.f32.gmra.mxu3 %vm449_vm1, %v442_v26 }
  0x87   : >> { %1699 = vmatmul.msk.f32.gmra.mxu0 %vm449_vm1, %v443_v27 }
  0x88   : >> { %1715 = vmatmul.msk.f32.gmra.mxu1 %vm449_vm1, %v443_v27 }
  0x89   : >> { %1731 = vmatmul.msk.f32.gmra.mxu2 %vm449_vm1, %v443_v27  ;;  %1747 = vmatmul.msk.f32.gmra.mxu3 %vm449_vm1, %v443_v27 }
  0x8f   : >> { %1700 = vmatmul.msk.f32.gmra.mxu0 %vm449_vm1, %v444_v30 }
  0x90   : >> { %1716 = vmatmul.msk.f32.gmra.mxu1 %vm449_vm1, %v444_v30 }
  0x91   : >> { %1732 = vmatmul.msk.f32.gmra.mxu2 %vm449_vm1, %v444_v30  ;;  %1748 = vmatmul.msk.f32.gmra.mxu3 %vm449_vm1, %v444_v30 }
  0x95   : >> { %v2353_v61 = vpop.permute.xlu2 %785 }
  0x97   : >> { %1701 = vmatmul.msk.f32.gmra.mxu0 %vm449_vm1, %v445_v35 }
  0x98   : >> { %1717 = vmatmul.msk.f32.gmra.mxu1 %vm449_vm1, %v445_v35 }
  0x99   : >> { %1733 = vmatmul.msk.f32.gmra.mxu2 %vm449_vm1, %v445_v35  ;;  %1749 = vmatmul.msk.f32.gmra.mxu3 %vm449_vm1, %v445_v35 }
  0x9d   : >> { %v781_v24 = vpop.permute.xlu2 %780 }
  0x9f   : >> { %1702 = vmatmul.msk.f32.gmra.mxu0 %vm449_vm1, %v446_v40 }
  0xa0   : >> { %1718 = vmatmul.msk.f32.gmra.mxu1 %vm449_vm1, %v446_v40 }
  0xa1   : >> { %1734 = vmatmul.msk.f32.gmra.mxu2 %vm449_vm1, %v446_v40  ;;  %1750 = vmatmul.msk.f32.gmra.mxu3 %vm449_vm1, %v446_v40 }
  0xa7   : >> { %1703 = vmatmul.msk.f32.gmra.mxu0 %vm449_vm1, %v447_v45 }
  0xa8   : >> { %1719 = vmatmul.msk.f32.gmra.mxu1 %vm449_vm1, %v447_v45 }
  0xa9   : >> { %1735 = vmatmul.msk.f32.gmra.mxu2 %vm449_vm1, %v447_v45  ;;  %1751 = vmatmul.msk.f32.gmra.mxu3 %vm449_vm1, %v447_v45 }
  0xac   : >> { %v806_v55 = vpop.permute.xlu0 %805  ;;  %v796_v56 = vpop.permute.xlu1 %795 }
  0xaf   : >> { %1704 = vmatmul.msk.f32.gmra.mxu0 %vm449_vm1, %v448_v50 }
  0xb0   : >> { %1720 = vmatmul.msk.f32.gmra.mxu1 %vm449_vm1, %v448_v50 }
  0xb1   : >> { %1736 = vmatmul.msk.f32.gmra.mxu2 %vm449_vm1, %v448_v50  ;;  %1752 = vmatmul.msk.f32.gmra.mxu3 %vm449_vm1, %v448_v50 }
  0xb4   : >> { %v2298_v28 = vpop.f32.mrf.mxu0  ;;  %v801_v62 = vpop.permute.xlu0 %800 }
  0xb5   : >> { %v2300_v29 = vpop.f32.mrf.mxu1  ;;  %v791_v10 = vpop.permute.xlu1 %790 }
  0xbc   : >> { %v2307_v31 = vpop.f32.mrf.mxu2  ;;  %v2309_v32 = vpop.f32.mrf.mxu3 }
  0xbd   : >> { %v2311_v33 = vpop.f32.mrf.mxu0  ;;  %v2313_v34 = vpop.f32.mrf.mxu1 }
  0xbe   : >> { %v776_v50 = vpop.permute.xlu0 %775 }
  0xc4   : >> { %v2320_v36 = vpop.f32.mrf.mxu2  ;;  %v2322_v37 = vpop.f32.mrf.mxu3 }
  0xc5   : >> { %v2324_v38 = vpop.f32.mrf.mxu0  ;;  %v2326_v39 = vpop.f32.mrf.mxu1 }
  0xcc   : >> { %v2333_v41 = vpop.f32.mrf.mxu2  ;;  %v2335_v42 = vpop.f32.mrf.mxu3 }
  0xcd   : >> { %v524_v43 = vpop.f32.mrf.mxu0  ;;  %v589_v44 = vpop.f32.mrf.mxu1 }
  0xce   : >> { %v820_v21 = vadd.f32 %v2353_v61, %v524_v43  ;;  %v821_v25 = vadd.f32 %v2353_v61, %v589_v44 }
  0xd4   : >> { %v2342_v46 = vpop.f32.mrf.mxu2  ;;  %v2344_v47 = vpop.f32.mrf.mxu3 }
  0xd5   : >> { %v527_v48 = vpop.f32.mrf.mxu0  ;;  %v592_v49 = vpop.f32.mrf.mxu1 }
  0xd6   : >> { %v824_v17 = vadd.f32 %v791_v10, %v527_v48  ;;  %v825_v19 = vadd.f32 %v791_v10, %v592_v49  ;;  %v816_v49 = vadd.f32 %v781_v24, %v2324_v38  ;;  %v813_v38 = vadd.f32 %v776_v50, %v2313_v34 }
  0xd7   : >> { %v823_v34 = vadd.f32 %v2353_v61, %v2344_v47 }
  0xd8   : >> { %v856_v40 = vmax.f32 %v824_v17, 0.0 }
  0xdc   : >> { %v657_v51 = vpop.f32.mrf.mxu2  ;;  %v2351_v52 = vpop.f32.mrf.mxu3 }
  0xdd   : >> { %v530_v53 = vpop.f32.mrf.mxu0  ;;  %v595_v54 = vpop.f32.mrf.mxu1 }
  0xde   : >> { %v828_v13 = vadd.f32 %v796_v56, %v530_v53  ;;  %v829_v15 = vadd.f32 %v796_v56, %v595_v54  ;;  %v857_v53 = vmax.f32 %v825_v19, 0.0 }
  0xe0   : >> { %v860_v22 = vmax.f32 %v828_v13, 0.0  ;;  %v861_v26 = vmax.f32 %v829_v15, 0.0  ;;  %v874_v15 = vld [vmem:[%s873_s23] sm:$0xff] }
  0xe4   : >> { %v660_v57 = vpop.f32.mrf.mxu2  ;;  %v725_v58 = vpop.f32.mrf.mxu3 }
  0xe5   : >> { %v533_v59 = vpop.f32.mrf.mxu0  ;;  %v598_v60 = vpop.f32.mrf.mxu1  ;;  %v830_v43 = vadd.f32 %v796_v56, %v660_v57  ;;  %v831_v44 = vadd.f32 %v796_v56, %v725_v58  ;;  %v827_v57 = vadd.f32 %v791_v10, %v2351_v52 }
  0xe6   : >> { %v832_v7 = vadd.f32 %v801_v62, %v533_v59  ;;  %v833_v11 = vadd.f32 %v801_v62, %v598_v60  ;;  %v817_v59 = vadd.f32 %v781_v24, %v2326_v39  ;;  %v852_v60 = vmax.f32 %v820_v21, 0.0 }
  0xe7   : >> { %v848_v39 = vmax.f32 %v816_v49, 0.0  ;;  %v862_v58 = vmax.f32 %v830_v43, 0.0  ;;  %v863_v52 = vmax.f32 %v831_v44, 0.0 }
  0xe8   : >> { %v864_v18 = vmax.f32 %v832_v7, 0.0  ;;  %v865_v20 = vmax.f32 %v833_v11, 0.0  ;;  %v771_v7 = vpop.permute.xlu1 %770  ;;  %v845_v11 = vmax.f32 %v813_v38, 0.0 }
  0xe9   : >> { %v808_v56 = vadd.f32 %v771_v7, %v2298_v28  ;;  %v818_v28 = vadd.f32 %v781_v24, %v2333_v41  ;;  %v815_v41 = vadd.f32 %v776_v50, %v2322_v37  ;;  %v810_v17 = vadd.f32 %v771_v7, %v2307_v31 }
  0xeb   : >> { %v840_v47 = vmax.f32 %v808_v56, 0.0  ;;  %v842_v37 = vmax.f32 %v810_v17, 0.0 }
  0xec   : >> { %v663_v63 = vpop.f32.mrf.mxu2  ;;  %v728_v0 = vpop.f32.mrf.mxu3 }
  0xed   : >> { %v536_v2 = vpop.f32.mrf.mxu0  ;;  %v601_v9 = vpop.f32.mrf.mxu1  ;;  %v834_v27 = vadd.f32 %v801_v62, %v663_v63  ;;  %v835_v45 = vadd.f32 %v801_v62, %v728_v0  ;;  %v812_v63 = vadd.f32 %v776_v50, %v2311_v33  ;;  %v826_v62 = vadd.f32 %v791_v10, %v657_v51 }
  0xee   : >> { %v836_v8 = vadd.f32 %v806_v55, %v536_v2  ;;  %v837_v12 = vadd.f32 %v806_v55, %v601_v9  ;;  %v822_v33 = vadd.f32 %v2353_v61, %v2342_v46  ;;  %v849_v51 = vmax.f32 %v817_v59, 0.0 }
  0xef   : >> { %v867_v0 = vmax.f32 %v835_v45, 0.0  ;;  %v809_v9 = vadd.f32 %v771_v7, %v2300_v29  ;;  %v844_v10 = vmax.f32 %v812_v63, 0.0  ;;  %v858_v46 = vmax.f32 %v826_v62, 0.0 }
  0xf0   : >> { %v868_v14 = vmax.f32 %v836_v8, 0.0  ;;  %v869_v16 = vmax.f32 %v837_v12, 0.0  ;;  %v853_v8 = vmax.f32 %v821_v25, 0.0  ;;  %v819_v29 = vadd.f32 %v781_v24, %v2335_v42 }
  0xf1   : >> { %v859_v12 = vmax.f32 %v827_v57, 0.0  ;;  %v814_v61 = vadd.f32 %v776_v50, %v2320_v36  ;;  %v854_v13 = vmax.f32 %v822_v33, 0.0  ;;  %v850_v42 = vmax.f32 %v818_v28, 0.0  ;;  %v880_v33 = vpop.permute.xlu2 %879 }
  0xf2   : >> { %894 = vmatpush.msrb.mxu0 %v868_v14  ;;  %914 = vmatpush.msrb.mxu1 %v869_v16  ;;  %v841_v14 = vmax.f32 %v809_v9, 0.0  ;;  %v855_v16 = vmax.f32 %v823_v34, 0.0  ;;  %v851_v19 = vmax.f32 %v819_v29, 0.0 }
  0xf3   : >> { %v846_v36 = vmax.f32 %v814_v61, 0.0 }
  0xf4   : >> { %v666_v23 = vpop.f32.mrf.mxu2  ;;  %895 = vmatpush.msrb.mxu0 %v864_v18  ;;  %v731_v35 = vpop.f32.mrf.mxu3  ;;  %915 = vmatpush.msrb.mxu1 %v865_v20  ;;  %v811_v18 = vadd.f32 %v771_v7, %v2309_v32  ;;  %v847_v20 = vmax.f32 %v815_v41, 0.0 }
  0xf5   : >> { %v838_v30 = vadd.f32 %v806_v55, %v666_v23  ;;  %v839_v48 = vadd.f32 %v806_v55, %v731_v35  ;;  %v866_v55 = vmax.f32 %v834_v27, 0.0  ;;  %v2383_v31 = vpop.f32.mrf.mxu0  ;;  %v2385_v32 = vpop.f32.mrf.mxu1 }
  0xf6   : >> { %896 = vmatpush.msrb.mxu0 %v860_v22  ;;  %916 = vmatpush.msrb.mxu1 %v861_v26  ;;  %v843_v21 = vmax.f32 %v811_v18, 0.0 }
  0xf7   : >> { %v870_v54 = vmax.f32 %v838_v30, 0.0  ;;  %v871_v2 = vmax.f32 %v839_v48, 0.0 }
  0xf8   : >> { %897 = vmatpush.msrb.mxu0 %v856_v40  ;;  %917 = vmatpush.msrb.mxu1 %v857_v53 }
  0xf9   : >> { %934 = vmatpush.msrb.mxu2 %v870_v54  ;;  %954 = vmatpush.msrb.mxu3 %v871_v2 }
  0xfa   : >> { %898 = vmatpush.msrb.mxu0 %v852_v60  ;;  %918 = vmatpush.msrb.mxu1 %v853_v8 }
  0xfb   : >> { %935 = vmatpush.msrb.mxu2 %v866_v55  ;;  %955 = vmatpush.msrb.mxu3 %v867_v0 }
  0xfc   : >> { %899 = vmatpush.msrb.mxu0 %v848_v39  ;;  %919 = vmatpush.msrb.mxu1 %v849_v51  ;;  %v2387_v22 = vpop.f32.mrf.mxu2  ;;  %v2389_v23 = vpop.f32.mrf.mxu3 }
  0xfd   : >> { %936 = vmatpush.msrb.mxu2 %v862_v58  ;;  %956 = vmatpush.msrb.mxu3 %v863_v52  ;;  %2718 = vst [vmem:[#allocation24_spill] sm:$0xff] %v2387_v22  ;;  %v2391_v24 = vpop.f32.mrf.mxu0  ;;  %v2393_v25 = vpop.f32.mrf.mxu1 }
  0xfe   : >> { %900 = vmatpush.msrb.mxu0 %v844_v10  ;;  %920 = vmatpush.msrb.mxu1 %v845_v11  ;;  %2719 = vst [vmem:[#allocation25_spill] sm:$0xff] %v2389_v23 }
  0xff   : >> { %937 = vmatpush.msrb.mxu2 %v858_v46  ;;  %957 = vmatpush.msrb.mxu3 %v859_v12 }
 0x100   : >> { %901 = vmatpush.msrb.mxu0 %v840_v47  ;;  %921 = vmatpush.msrb.mxu1 %v841_v14 }
 0x101   : >> { %938 = vmatpush.msrb.mxu2 %v854_v13  ;;  %958 = vmatpush.msrb.mxu3 %v855_v16 }
 0x102   : >> { %1755 = vmatmul.msk.f32.vlgmr.msrb.gmra.mxu0 %vm882_vm2, %v874_v15  ;;  %1756 = vmatmul.msk.f32.vlgmr.msrb.gmra.mxu1 %vm882_vm2, %v874_v15 }
 0x103   : >> { %939 = vmatpush.msrb.mxu2 %v850_v42  ;;  %959 = vmatpush.msrb.mxu3 %v851_v19 }
 0x104   : >> { %v2395_v26 = vpop.f32.mrf.mxu2  ;;  %v2397_v27 = vpop.f32.mrf.mxu3 }
 0x105   : >> { %940 = vmatpush.msrb.mxu2 %v846_v36  ;;  %960 = vmatpush.msrb.mxu3 %v847_v20  ;;  %2720 = vst [vmem:[#allocation26_spill] sm:$0xff] %v2395_v26  ;;  %v2399_v30 = vpop.f32.mrf.mxu0  ;;  %v2401_v35 = vpop.f32.mrf.mxu1 }
 0x106   : >> { %2721 = vst [vmem:[#allocation27_spill] sm:$0xff] %v2397_v27 }
 0x107   : >> { %941 = vmatpush.msrb.mxu2 %v842_v37  ;;  %961 = vmatpush.msrb.mxu3 %v843_v21 }
 0x108   : >> { %1757 = vmatmul.msk.f32.vlgmr.msrb.gmra.mxu2 %vm882_vm2, %v874_v15  ;;  %1758 = vmatmul.msk.f32.vlgmr.msrb.gmra.mxu3 %vm882_vm2, %v874_v15 }
 0x10c   : >> { %v2403_v40 = vpop.f32.mrf.mxu2  ;;  %v2405_v45 = vpop.f32.mrf.mxu3 }
 0x10d   : >> { %v2407_v48 = vpop.f32.mrf.mxu0  ;;  %v2409_v49 = vpop.f32.mrf.mxu1 }
 0x114   : >> { %v2411_v50 = vpop.f32.mrf.mxu2  ;;  %v2413_v53 = vpop.f32.mrf.mxu3 }
 0x115   : >> { %v2415_v43 = vpop.f32.mrf.mxu0  ;;  %v2417_v54 = vpop.f32.mrf.mxu1 }
 0x11c   : >> { %v2419_v59 = vpop.f32.mrf.mxu2  ;;  %v2421_v60 = vpop.f32.mrf.mxu3 }
 0x11d   : >> { %v2423_v44 = vpop.f32.mrf.mxu0  ;;  %v2425_v2 = vpop.f32.mrf.mxu1 }
 0x124   : >> { %v2427_v63 = vpop.f32.mrf.mxu2  ;;  %v2429_v7 = vpop.f32.mrf.mxu3 }
 0x125   : >> { %v2431_v8 = vpop.f32.mrf.mxu0  ;;  %v2433_v62 = vpop.f32.mrf.mxu1 }
 0x12c   : >> { %v2435_v55 = vpop.f32.mrf.mxu2  ;;  %v2437_v38 = vpop.f32.mrf.mxu3 }
 0x12d   : >> { %v2439_v57 = vpop.f32.mrf.mxu0  ;;  %v2441_v0 = vpop.f32.mrf.mxu1 }
 0x134   : >> { %v2443_v39 = vpop.f32.mrf.mxu2  ;;  %v2445_v56 = vpop.f32.mrf.mxu3 }
 0x17f   : >> { %v903_v58 = vpop.f32.mrf.mxu0  ;;  %v923_v9 = vpop.f32.mrf.mxu1 }
 0x180   : >> { %v2447_v51 = vadd.f32 %v903_v58, %v880_v33  ;;  %v2449_v34 = vadd.f32 %v923_v9, %v880_v33 }
 0x182   : >> { %2722 = vst [vmem:[#allocation28_spill] sm:$0xff] %v2447_v51 }
 0x183   : >> { %2723 = vst [vmem:[#allocation29_spill] sm:$0xff] %v2449_v34 }
 0x184   : >> { %970 = vst [vmem:[#allocation1] sm:$0xff] %v2447_v51 }
 0x185   : >> { %971 = vst [vmem:[#allocation1 + $0x9] sm:$0xff] %v2449_v34 }
 0x18b   : >> { %v943_v52 = vpop.f32.mrf.mxu2  ;;  %v963_v28 = vpop.f32.mrf.mxu3 }
 0x18c   : >> { %v2454_v10 = vadd.f32 %v943_v52, %v880_v33  ;;  %v2456_v46 = vadd.f32 %v963_v28, %v880_v33 }
 0x18e   : >> { %2724 = vst [vmem:[#allocation30_spill] sm:$0xff] %v2454_v10 }
 0x18f   : >> { %2725 = vst [vmem:[#allocation31_spill] sm:$0xff] %v2456_v46 }
 0x190   : >> { %972 = vst [vmem:[#allocation1 + $0x12] sm:$0xff] %v2454_v10 }
 0x191   : >> { %973 = vst [vmem:[#allocation1 + $0x1b] sm:$0xff] %v2456_v46 }
 0x195   : >> { %992 = sbr.rel (%p1762_p0) target bundleno = 765 (0x2fd), region = 63 }
 0x198   : >> { %v975_v11 = vld [vmem:[#allocation1 + $0x4] ss:$9 sm:$0xff] }
 0x199   : >> { %985 = vst.msk [vmem:[%s984_s11] ss:$4 sm:$0xf] %vm2169_vm0, %v975_v11 }
 0x19a   : >> { %1041 = vmatpush.msra.mxu0 %v2447_v51  ;;  %1082 = vmatpush.msra.mxu1 %v2449_v34  ;;  %s2472_s13 = scalar_lea.vmem %s2669_s6, %s1753_s25  ;;  %s1256_s17 = scalar_lea.vmem %s2671_s8, %s2027_s22  ;;  %v2032_v1 = vmov 0  }
 0x19b   : >> { %1123 = vmatpush.msra.mxu2 %v2454_v10  ;;  %1164 = vmatpush.msra.mxu3 %v2456_v46  ;;  %v994_v29 = vld [vmem:[%s2472_s13] sm:$0xff]  ;;  %v995_v12 = vld [vmem:[%s2472_s13 + $0x8] sm:$0xff]  ;;  %v996_v47 = vld [vmem:[%s2472_s13 + $0x10] sm:$0xff]  ;;  %s1254_s27 = scalar_lea.vmem %s2670_s7, %s2027_s22 }
 0x19c   : >> { %1763 = vmatmul.msk.f32.vlgmr.msra.gmra.mxu0 %vm449_vm1, %v994_v29  ;;  %1771 = vmatmul.msk.f32.vlgmr.msra.gmra.mxu1 %vm449_vm1, %v994_v29  ;;  %v997_v61 = vld [vmem:[%s2472_s13 + $0x18] sm:$0xff]  ;;  %v998_v13 = vld [vmem:[%s2472_s13 + $0x20] sm:$0xff]  ;;  %v999_v14 = vld [vmem:[%s2472_s13 + $0x28] sm:$0xff] }
 0x19d   : >> { %1779 = vmatmul.msk.f32.vlgmr.msra.gmra.mxu2 %vm449_vm1, %v994_v29  ;;  %1787 = vmatmul.msk.f32.vlgmr.msra.gmra.mxu3 %vm449_vm1, %v994_v29  ;;  %v1000_v15 = vld [vmem:[%s2472_s13 + $0x30] sm:$0xff]  ;;  %v1001_v41 = vld [vmem:[%s2472_s13 + $0x38] sm:$0xff]  ;;  %v1257_v6 = vld [vmem:[%s1256_s17] sm:$0x1] }
 0x19e   : >> { %1892 = vset.pattern.permute.xlu0 %v2032_v1 }
 0x19f   : >> { %1260 = vperm.xlu0 %1892, %v1257_v6  }
 0x1a4   : >> { %1764 = vmatmul.msk.f32.gmra.mxu0 %vm449_vm1, %v995_v12  ;;  %1772 = vmatmul.msk.f32.gmra.mxu1 %vm449_vm1, %v995_v12 }
 0x1a5   : >> { %1780 = vmatmul.msk.f32.gmra.mxu2 %vm449_vm1, %v995_v12  ;;  %1788 = vmatmul.msk.f32.gmra.mxu3 %vm449_vm1, %v995_v12 }
 0x1ac   : >> { %1765 = vmatmul.msk.f32.gmra.mxu0 %vm449_vm1, %v996_v47  ;;  %1773 = vmatmul.msk.f32.gmra.mxu1 %vm449_vm1, %v996_v47 }
 0x1ad   : >> { %1781 = vmatmul.msk.f32.gmra.mxu2 %vm449_vm1, %v996_v47  ;;  %1789 = vmatmul.msk.f32.gmra.mxu3 %vm449_vm1, %v996_v47 }
 0x1b4   : >> { %1766 = vmatmul.msk.f32.gmra.mxu0 %vm449_vm1, %v997_v61  ;;  %1774 = vmatmul.msk.f32.gmra.mxu1 %vm449_vm1, %v997_v61 }
 0x1b5   : >> { %1782 = vmatmul.msk.f32.gmra.mxu2 %vm449_vm1, %v997_v61  ;;  %1790 = vmatmul.msk.f32.gmra.mxu3 %vm449_vm1, %v997_v61 }
 0x1bc   : >> { %1767 = vmatmul.msk.f32.gmra.mxu0 %vm449_vm1, %v998_v13  ;;  %1775 = vmatmul.msk.f32.gmra.mxu1 %vm449_vm1, %v998_v13 }
 0x1bd   : >> { %1783 = vmatmul.msk.f32.gmra.mxu2 %vm449_vm1, %v998_v13  ;;  %1791 = vmatmul.msk.f32.gmra.mxu3 %vm449_vm1, %v998_v13 }
 0x1c4   : >> { %1768 = vmatmul.msk.f32.gmra.mxu0 %vm449_vm1, %v999_v14  ;;  %1776 = vmatmul.msk.f32.gmra.mxu1 %vm449_vm1, %v999_v14 }
 0x1c5   : >> { %1784 = vmatmul.msk.f32.gmra.mxu2 %vm449_vm1, %v999_v14  ;;  %1792 = vmatmul.msk.f32.gmra.mxu3 %vm449_vm1, %v999_v14 }
 0x1cc   : >> { %1769 = vmatmul.msk.f32.gmra.mxu0 %vm449_vm1, %v1000_v15  ;;  %1777 = vmatmul.msk.f32.gmra.mxu1 %vm449_vm1, %v1000_v15 }
 0x1cd   : >> { %1785 = vmatmul.msk.f32.gmra.mxu2 %vm449_vm1, %v1000_v15  ;;  %1793 = vmatmul.msk.f32.gmra.mxu3 %vm449_vm1, %v1000_v15 }
 0x1d4   : >> { %1770 = vmatmul.msk.f32.gmra.mxu0 %vm449_vm1, %v1001_v41  ;;  %1778 = vmatmul.msk.f32.gmra.mxu1 %vm449_vm1, %v1001_v41 }
 0x1d5   : >> { %1786 = vmatmul.msk.f32.gmra.mxu2 %vm449_vm1, %v1001_v41  ;;  %1794 = vmatmul.msk.f32.gmra.mxu3 %vm449_vm1, %v1001_v41 }
 0x219   : >> { %v2516_v16 = vpop.f32.mrf.mxu0  ;;  %v2518_v17 = vpop.f32.mrf.mxu1 }
 0x220   : >> { %v2520_v42 = vpop.f32.mrf.mxu2  ;;  %v2522_v18 = vpop.f32.mrf.mxu3 }
 0x221   : >> { %2727 = vst [vmem:[#allocation32_spill] sm:$0xff] %v2520_v42  ;;  %v2524_v19 = vpop.f32.mrf.mxu0  ;;  %v2526_v36 = vpop.f32.mrf.mxu1 }
 0x222   : >> { %2728 = vst [vmem:[#allocation33_spill] sm:$0xff] %v2522_v18 }
 0x228   : >> { %v2528_v20 = vpop.f32.mrf.mxu2  ;;  %v2530_v37 = vpop.f32.mrf.mxu3 }
 0x229   : >> { %2729 = vst [vmem:[#allocation34_spill] sm:$0xff] %v2528_v20  ;;  %v1049_v21 = vpop.f32.mrf.mxu0  ;;  %v1090_v33 = vpop.f32.mrf.mxu1 }
 0x22a   : >> { %2730 = vst [vmem:[#allocation35_spill] sm:$0xff] %v2530_v37 }
 0x230   : >> { %v2532_v58 = vpop.f32.mrf.mxu2  ;;  %v2534_v9 = vpop.f32.mrf.mxu3 }
 0x231   : >> { %v1052_v52 = vpop.f32.mrf.mxu0  ;;  %v1093_v28 = vpop.f32.mrf.mxu1 }
 0x238   : >> { %v2536_v11 = vpop.f32.mrf.mxu2  ;;  %v2538_v29 = vpop.f32.mrf.mxu3 }
 0x239   : >> { %v1055_v12 = vpop.f32.mrf.mxu0  ;;  %v1096_v47 = vpop.f32.mrf.mxu1 }
 0x240   : >> { %v1137_v61 = vpop.f32.mrf.mxu2  ;;  %v1178_v13 = vpop.f32.mrf.mxu3 }
 0x241   : >> { %v1058_v14 = vpop.f32.mrf.mxu0  ;;  %v1099_v15 = vpop.f32.mrf.mxu1 }
 0x242   : >> { %v1210_v37 = vadd.f32 %v1058_v14, %v2423_v44  ;;  %v1211_v27 = vadd.f32 %v1099_v15, %v2425_v2  ;;  %v1255_v15 = vld [vmem:[%s1254_s27] sm:$0x1] }
 0x248   : >> { %v1140_v41 = vpop.f32.mrf.mxu2  ;;  %v1181_v3 = vpop.f32.mrf.mxu3 }
 0x249   : >> { %v1061_v4 = vpop.f32.mrf.mxu0  ;;  %v1102_v5 = vpop.f32.mrf.mxu1 }
 0x24a   : >> { %v1214_v51 = vadd.f32 %v1061_v4, %v2431_v8  ;;  %v1215_v46 = vadd.f32 %v1102_v5, %v2433_v62  ;;  %v1206_v4 = vadd.f32 %v1055_v12, %v2415_v43  ;;  %v1207_v5 = vadd.f32 %v1096_v47, %v2417_v54  ;;  %v2737_v12 = vld [vmem:[#allocation25_spill] sm:$0xff] }
 0x24b   : >> { %v1202_v8 = vadd.f32 %v1052_v52, %v2407_v48  ;;  %v1203_v62 = vadd.f32 %v1093_v28, %v2409_v49  ;;  %v1199_v48 = vadd.f32 %v1090_v33, %v2401_v35  ;;  %v1208_v35 = vadd.f32 %v1137_v61, %v2419_v59  ;;  %v2733_v52 = vld [vmem:[#allocation27_spill] sm:$0xff]  ;;  %v2738_v47 = vld [vmem:[#allocation33_spill] sm:$0xff] }
 0x24c   : >> { %v1246_v20 = vmax.f32 %v1214_v51, 0.0  ;;  %v1247_v26 = vmax.f32 %v1215_v46, 0.0  ;;  %v1198_v51 = vadd.f32 %v1049_v21, %v2399_v30  ;;  %v1238_v46 = vmax.f32 %v1206_v4, 0.0  ;;  %v2732_v21 = vld [vmem:[#allocation34_spill] sm:$0xff] }
 0x24d   : >> { %v1239_v49 = vmax.f32 %v1207_v5, 0.0  ;;  %v1235_v30 = vmax.f32 %v1203_v62, 0.0  ;;  %v1205_v59 = vadd.f32 %v2538_v29, %v2413_v53  ;;  %v1193_v61 = vadd.f32 %v2738_v47, %v2737_v12  ;;  %v2739_v5 = vld [vmem:[#allocation29_spill] sm:$0xff] }
 0x24f   : >> { %v1225_v4 = vmax.f32 %v1193_v61, 0.0 }
 0x250   : >> { %v1143_v10 = vpop.f32.mrf.mxu2  ;;  %v1184_v34 = vpop.f32.mrf.mxu3 }
 0x251   : >> { %v1064_v18 = vpop.f32.mrf.mxu0  ;;  %v1105_v23 = vpop.f32.mrf.mxu1  ;;  %v1216_v2 = vadd.f32 %v1143_v10, %v2435_v55 }
 0x252   : >> { %v1218_v42 = vadd.f32 %v1064_v18, %v2439_v57  ;;  %v1219_v22 = vadd.f32 %v1105_v23, %v2441_v0  ;;  %v1242_v57 = vmax.f32 %v1210_v37, 0.0  ;;  %v1243_v23 = vmax.f32 %v1211_v27, 0.0  ;;  %v2731_v37 = vld [vmem:[#allocation26_spill] sm:$0xff] }
 0x253   : >> { %v1212_v27 = vadd.f32 %v1140_v41, %v2427_v63  ;;  %v1248_v10 = vmax.f32 %v1216_v2, 0.0  ;;  %v1204_v18 = vadd.f32 %v2536_v11, %v2411_v50  ;;  %v1196_v33 = vadd.f32 %v2732_v21, %v2731_v37  ;;  %v2736_v11 = vld [vmem:[#allocation32_spill] sm:$0xff] }
 0x254   : >> { %v1250_v1 = vmax.f32 %v1218_v42, 0.0  ;;  %v1251_v6 = vmax.f32 %v1219_v22, 0.0  ;;  %v1217_v22 = vadd.f32 %v1184_v34, %v2437_v38  ;;  %v1194_v38 = vadd.f32 %v2524_v19, %v2391_v24  ;;  %v2742_v2 = vld [vmem:[#allocation28_spill] sm:$0xff] }
 0x255   : >> { %v1209_v34 = vadd.f32 %v1178_v13, %v2421_v60  ;;  %v1191_v24 = vadd.f32 %v2518_v17, %v2385_v32  ;;  %v1244_v60 = vmax.f32 %v1212_v27, 0.0  ;;  %v1200_v32 = vadd.f32 %v2532_v58, %v2403_v40  ;;  %v2734_v40 = vld [vmem:[#allocation35_spill] sm:$0xff] }
 0x256   : >> { %1275 = vmatpush.msrb.mxu0 %v1250_v1  ;;  %1295 = vmatpush.msrb.mxu1 %v1251_v6  ;;  %v1249_v63 = vmax.f32 %v1217_v22, 0.0  ;;  %v1240_v17 = vmax.f32 %v1208_v35, 0.0  ;;  %v1197_v58 = vadd.f32 %v2734_v40, %v2733_v52  ;;  %v1236_v28 = vmax.f32 %v1204_v18, 0.0 }
 0x257   : >> { %v1241_v50 = vmax.f32 %v1209_v34, 0.0  ;;  %v1232_v13 = vmax.f32 %v1200_v32, 0.0  ;;  %v1228_v41 = vmax.f32 %v1196_v33, 0.0  ;;  %v1347_v22 = vsub.f32 0.0, %v2742_v2 }
 0x258   : >> { %v1146_v0 = vpop.f32.mrf.mxu2  ;;  %v1187_v44 = vpop.f32.mrf.mxu3  ;;  %1276 = vmatpush.msrb.mxu0 %v1246_v20  ;;  %1296 = vmatpush.msrb.mxu1 %v1247_v26  ;;  %v1213_v26 = vadd.f32 %v1181_v3, %v2429_v7  ;;  %v1190_v3 = vadd.f32 %v2516_v16, %v2383_v31  ;;  %v1230_v7 = vmax.f32 %v1198_v51, 0.0  ;;  %v1201_v16 = vadd.f32 %v2534_v9, %v2405_v45  ;;  %v2735_v9 = vld [vmem:[#allocation24_spill] sm:$0xff] }
 0x259   : >> { %v1220_v43 = vadd.f32 %v1146_v0, %v2443_v39  ;;  %v1221_v54 = vadd.f32 %v1187_v44, %v2445_v56  ;;  %v1195_v39 = vadd.f32 %v2526_v36, %v2393_v25  ;;  %v1234_v56 = vmax.f32 %v1202_v8, 0.0  ;;  %v2741_v0 = vld [vmem:[#allocation31_spill] sm:$0xff] }
 0x25a   : >> { %1277 = vmatpush.msrb.mxu0 %v1242_v57  ;;  %1297 = vmatpush.msrb.mxu1 %v1243_v23  ;;  %v1231_v25 = vmax.f32 %v1199_v48, 0.0  ;;  %v1245_v19 = vmax.f32 %v1213_v26, 0.0  ;;  %v1226_v36 = vmax.f32 %v1194_v38, 0.0  ;;  %v1222_v53 = vmax.f32 %v1190_v3, 0.0  ;;  %v2740_v57 = vld [vmem:[#allocation30_spill] sm:$0xff] }
 0x25b   : >> { %v1252_v42 = vmax.f32 %v1220_v43, 0.0  ;;  %v1253_v55 = vmax.f32 %v1221_v54, 0.0  ;;  %v1227_v31 = vmax.f32 %v1195_v39, 0.0  ;;  %v1223_v20 = vmax.f32 %v1191_v24, 0.0 }
 0x25c   : >> { %1278 = vmatpush.msrb.mxu0 %v1238_v46  ;;  %1298 = vmatpush.msrb.mxu1 %v1239_v49  ;;  %v1237_v45 = vmax.f32 %v1205_v59, 0.0  ;;  %v1192_v29 = vadd.f32 %v2736_v11, %v2735_v9  ;;  %v1233_v14 = vmax.f32 %v1201_v16, 0.0  ;;  %v1229_v1 = vmax.f32 %v1197_v58, 0.0 }
 0x25d   : >> { %1315 = vmatpush.msrb.mxu2 %v1252_v42  ;;  %1335 = vmatpush.msrb.mxu3 %v1253_v55  ;;  %v1348_v8 = vsub.f32 0.0, %v2739_v5  ;;  %v1349_v23 = vsub.f32 0.0, %v2740_v57  ;;  %v1350_v44 = vsub.f32 0.0, %v2741_v0  ;;  %v1351_v51 = vmul.f32 1.442695, %v1347_v22 }
 0x25e   : >> { %1279 = vmatpush.msrb.mxu0 %v1234_v56  ;;  %1299 = vmatpush.msrb.mxu1 %v1235_v30  ;;  %v1224_v6 = vmax.f32 %v1192_v29, 0.0  ;;  %v1439_v22 = vrot.slane %v2739_v5, 3 }
 0x25f   : >> { %1316 = vmatpush.msrb.mxu2 %v1248_v10  ;;  %1336 = vmatpush.msrb.mxu3 %v1249_v63  ;;  %v1353_v62 = vmul.f32 1.442695, %v1348_v8  ;;  %v1355_v43 = vmul.f32 1.442695, %v1349_v23  ;;  %v1357_v54 = vmul.f32 1.442695, %v1350_v44 }
 0x260   : >> { %1280 = vmatpush.msrb.mxu0 %v1230_v7  ;;  %1300 = vmatpush.msrb.mxu1 %v1231_v25 }
 0x261   : >> { %1317 = vmatpush.msrb.mxu2 %v1244_v60  ;;  %1337 = vmatpush.msrb.mxu3 %v1245_v19  ;;  %1893 = vpow2.f32 %v1353_v62 }
 0x262   : >> { %1281 = vmatpush.msrb.mxu0 %v1226_v36  ;;  %1301 = vmatpush.msrb.mxu1 %v1227_v31  ;;  %1895 = vpow2.f32 %v1355_v43 }
 0x263   : >> { %1318 = vmatpush.msrb.mxu2 %v1240_v17  ;;  %1338 = vmatpush.msrb.mxu3 %v1241_v50  ;;  %1897 = vpow2.f32 %v1357_v54 }
 0x264   : >> { %1282 = vmatpush.msrb.mxu0 %v1222_v53  ;;  %1302 = vmatpush.msrb.mxu1 %v1223_v20  ;;  %1899 = vpow2.f32 %v1351_v51 }
 0x265   : >> { %1319 = vmatpush.msrb.mxu2 %v1236_v28  ;;  %1339 = vmatpush.msrb.mxu3 %v1237_v45 }
 0x266   : >> { %1796 = vmatmul.msk.f32.vlgmr.msrb.gmra.mxu1 %vm882_vm2, %v1255_v15  ;;  %1795 = vmatmul.msk.f32.vlgmr.msrb.gmra.mxu0 %vm882_vm2, %v1255_v15 }
 0x267   : >> { %1320 = vmatpush.msrb.mxu2 %v1232_v13  ;;  %1340 = vmatpush.msrb.mxu3 %v1233_v14  ;;  %v1894_v48 = vpop.eup %1893 }
 0x268   : >> { %v1360_v46 = vadd.f32 1.0, %v1894_v48  ;;  %v1896_v49 = vpop.eup %1895 }
 0x269   : >> { %1321 = vmatpush.msrb.mxu2 %v1228_v41  ;;  %1341 = vmatpush.msrb.mxu3 %v1229_v1  ;;  %v1898_v27 = vpop.eup %1897  ;;  %v1361_v26 = vadd.f32 1.0, %v1896_v49  ;;  %v1423_v41 = vld [vmem:[#allocation2] sm:$0xf]  ;;  %v1440_v49 = vrot.slane %v2740_v57, 3 }
 0x26a   : >> { %1901 = vrcp.f32 %v1360_v46  ;;  %v1900_v42 = vpop.eup %1899  ;;  %v1362_v55 = vadd.f32 1.0, %v1898_v27  ;;  %vm1383_vm3 = vweird.f32 %v1360_v46  ;;  %v1389_v35 = vand.u32 2147483648, %v1360_v46 }
 0x26b   : >> { %1322 = vmatpush.msrb.mxu2 %v1224_v6  ;;  %1342 = vmatpush.msrb.mxu3 %v1225_v4  ;;  %1903 = vrcp.f32 %v1361_v26  ;;  %v1359_v38 = vadd.f32 1.0, %v1900_v42  ;;  %v1387_v63 = vand.u32 2147483647, %v1360_v46  ;;  %v1404_v32 = vand.u32 2147483648, %v1361_v26  ;;  %v1261_v4 = vpop.permute.xlu0 %1260 }
 0x26c   : >> { %1797 = vmatmul.msk.f32.vlgmr.msrb.gmra.mxu2 %vm882_vm2, %v1255_v15  ;;  %1798 = vmatmul.msk.f32.vlgmr.msrb.gmra.mxu3 %vm882_vm2, %v1255_v15  ;;  %1905 = vrcp.f32 %v1362_v55  ;;  %v1390_v60 = vor.u32 1.1754944e-38, %v1389_v35  ;;  %v1419_v17 = vand.u32 2147483648, %v1362_v55  ;;  %vm1398_vm7 = vweird.f32 %v1361_v26 }
 0x26d   : >> { %1907 = vrcp.f32 %v1359_v38  ;;  %vm1388_vm6 = vcmp.eq.f32.partialorder %v1387_v63, 8.507059e+37  ;;  %v1402_v21 = vand.u32 2147483647, %v1361_v26  ;;  %v1405_v33 = vor.u32 1.1754944e-38, %v1404_v32 }
 0x26e   : >> { %vm1413_vm10 = vweird.f32 %v1362_v55  ;;  %v1374_v58 = vand.u32 2147483648, %v1359_v38  ;;  %v1417_v28 = vand.u32 2147483647, %v1362_v55  ;;  %v1420_v45 = vor.u32 1.1754944e-38, %v1419_v17 }
 0x26f   : >> { %vm1403_vm11 = vcmp.eq.f32.partialorder %v1402_v21, 8.507059e+37  ;;  %vm1368_vm14 = vweird.f32 %v1359_v38  ;;  %v1372_v61 = vand.u32 2147483647, %v1359_v38  ;;  %v1263_v62 = vperm.slane %v1261_v4, 0 }
 0x270   : >> { %v1902_v39 = vpop.eup %1901  ;;  %vm1418_vm15 = vcmp.eq.f32.partialorder %v1417_v28, 8.507059e+37  ;;  %v1375_v13 = vor.u32 1.1754944e-38, %v1374_v58  ;;  %v1441_v27 = vrot.slane %v2741_v0, 3 }
 0x271   : >> { %v1379_v56 = vmul.f32 %v1902_v39, %v1360_v46  ;;  %v1904_v30 = vpop.eup %1903  ;;  %vm1384_vm4 = vweird.f32 %v1902_v39  ;;  %v1438_v46 = vrot.slane %v2742_v2, 3 }
 0x272   : >> { %v1906_v34 = vpop.eup %1905  ;;  %v1394_v3 = vmul.f32 %v1904_v30, %v1361_v26  ;;  %vm1385_vm5 = vmor %vm1383_vm3, %vm1384_vm4  ;;  %vm1399_vm8 = vweird.f32 %v1904_v30  ;;  %vm1373_vm3 = vcmp.eq.f32.partialorder %v1372_v61, 8.507059e+37  ;;  %vm1471_vm4 = vcmask 1042434  }
 0x273   : >> { %v1380_v10 = vsub.f32 1.0, %v1379_v56  ;;  %v1908_v24 = vpop.eup %1907  ;;  %v1409_v7 = vmul.f32 %v1906_v34, %v1362_v55  ;;  %vm1400_vm9 = vmor %vm1398_vm7, %vm1399_vm8  ;;  %vm1414_vm12 = vweird.f32 %v1906_v34 }
 0x274   : >> { %v1395_v18 = vsub.f32 1.0, %v1394_v3  ;;  %v1364_v59 = vmul.f32 %v1908_v24, %v1359_v38  ;;  %vm1415_vm13 = vmor %vm1413_vm10, %vm1414_vm12  ;;  %vm1369_vm1 = vweird.f32 %v1908_v24 }
 0x275   : >> { %v1381_v25 = vmul.f32 %v1902_v39, %v1380_v10  ;;  %v1410_v19 = vsub.f32 1.0, %v1409_v7  ;;  %vm1370_vm2 = vmor %vm1368_vm14, %vm1369_vm1  ;;  %v1437_v7 = vld [vmem:[%s2199_s26] sm:$0xf] }
 0x276   : >> { %v1396_v31 = vmul.f32 %v1904_v30, %v1395_v18  ;;  %v1365_v50 = vsub.f32 1.0, %v1364_v59 }
 0x277   : >> { %v1382_v36 = vadd.f32 %v1902_v39, %v1381_v25  ;;  %v1411_v16 = vmul.f32 %v1906_v34, %v1410_v19 }
 0x278   : >> { %v1397_v20 = vadd.f32 %v1904_v30, %v1396_v31  ;;  %v1366_v11 = vmul.f32 %v1908_v24, %v1365_v50 }
 0x279   : >> { %v1386_v53 = vsel %vm1385_vm5, %v1902_v39, %v1382_v36  ;;  %v1412_v52 = vadd.f32 %v1906_v34, %v1411_v16  ;;  %vm1469_vm5 = vcmask 1040384  }
 0x27a   : >> { %v1391_v37 = vsel %vm1388_vm6, %v1390_v60, %v1386_v53  ;;  %v1401_v40 = vsel %vm1400_vm9, %v1904_v30, %v1397_v20  ;;  %v1367_v47 = vadd.f32 %v1908_v24, %v1366_v11  ;;  %vm1473_vm6 = vcmask 1041408  }
 0x27b   : >> { %1429 = vst [vmem:[#allocation1 + $0x9] sm:$0xff] %v1391_v37  ;;  %v1406_v9 = vsel %vm1403_vm11, %v1405_v33, %v1401_v40  ;;  %v1416_v29 = vsel %vm1415_vm13, %v1906_v34, %v1412_v52  ;;  %v1451_v51 = vrot.slane %v1391_v37, 4 }
 0x27c   : >> { %1430 = vst [vmem:[#allocation1 + $0x12] sm:$0xff] %v1406_v9  ;;  %v1421_v12 = vsel %vm1418_vm15, %v1420_v45, %v1416_v29  ;;  %v1371_v14 = vsel %vm1370_vm2, %v1908_v24, %v1367_v47  ;;  %v1452_v42 = vrot.slane %v1406_v9, 4 }
 0x27d   : >> { %1431 = vst [vmem:[#allocation1 + $0x1b] sm:$0xff] %v1421_v12  ;;  %v1376_v15 = vsel %vm1373_vm3, %v1375_v13, %v1371_v14  ;;  %v1453_v38 = vrot.slane %v1421_v12, 4 }
 0x27e   : >> { %1428 = vst [vmem:[#allocation1] sm:$0xff] %v1376_v15  ;;  %v1450_v39 = vrot.slane %v1376_v15, 4 }
 0x285   : >> { %v1433_v1 = vld [vmem:[#allocation1 + $0x4] ss:$9 sm:$0xff] }
 0x286   : >> { %v1435_v6 = vadd.f32 %v1433_v1, %v1423_v41 }
 0x288   : >> { %1436 = vst.msk [vmem:[#allocation2] sm:$0xf] %vm2169_vm0, %v1435_v6 }
 0x2e3   : >> { %v1304_v23 = vpop.f32.mrf.mxu1  ;;  %v1284_v43 = vpop.f32.mrf.mxu0 }
 0x2e4   : >> { %v1305_v44 = vadd.f32 %v1304_v23, %v1263_v62  ;;  %v1285_v48 = vadd.f32 %v1284_v43, %v1263_v62 }
 0x2e6   : >> { %v1447_v54 = vadd.f32 %v1439_v22, %v1305_v44  ;;  %v1446_v5 = vadd.f32 %v1438_v46, %v1285_v48 }
 0x2e8   : >> { %v1459_v56 = vmul.f32 %v1451_v51, %v1447_v54  ;;  %v1458_v24 = vmul.f32 %v1450_v39, %v1446_v5 }
 0x2ea   : >> { %v1466_v63 = vrot.slane %v1459_v56, 7 }
 0x2ec   : >> { %v1470_v18 = vsel %vm1469_vm5, %v1458_v24, %v1466_v63 }
 0x2ef   : >> { %v1324_v26 = vpop.f32.mrf.mxu2  ;;  %v1344_v55 = vpop.f32.mrf.mxu3 }
 0x2f0   : >> { %v1325_v30 = vadd.f32 %v1324_v26, %v1263_v62  ;;  %v1345_v35 = vadd.f32 %v1344_v55, %v1263_v62 }
 0x2f2   : >> { %v1448_v34 = vadd.f32 %v1440_v49, %v1325_v30  ;;  %v1449_v10 = vadd.f32 %v1441_v27, %v1345_v35 }
 0x2f4   : >> { %v1460_v3 = vmul.f32 %v1452_v42, %v1448_v34  ;;  %v1461_v2 = vmul.f32 %v1453_v38, %v1449_v10 }
 0x2f6   : >> { %v1467_v57 = vrot.slane %v1460_v3, 6  ;;  %v1468_v0 = vrot.slane %v1461_v2, 5 }
 0x2f8   : >> { %v1472_v25 = vsel %vm1471_vm4, %v1467_v57, %v1468_v0 }
 0x2f9   : >> { %v1474_v59 = vsel %vm1473_vm6, %v1470_v18, %v1472_v25 }
 0x2fa   : >> { %v1476_v60 = vadd.f32 %v1474_v59, %v1437_v7 }
 0x2fc   : >> { %1477 = vst.msk [vmem:[%s2199_s26] sm:$0xf] %vm2169_vm0, %v1476_v60 }
 0x2fd PF: >> { %s430_s22 = sadd.s32 1, %s2027_s22  }
 0x2fe   : >> { %p427_p1 = scmp.ge.s32.totalorder %s430_s22, 3  }
 0x2ff   : > { %v1479_v19 = vld [vmem:[#allocation2] sm:$0xf] (%p427_p1)  ;;  %s1801_s30 = sshll.u32 (%p427_p1), %s2011_s21, 3  ;;  %s1521_s28 = sshll.u32 (%p427_p1), %s2199_s26, 4  ;;  %s1522_s28 = int_to_ptr.vmem [resolvable:$true] %s1521_s28 }
 0x300   : > { %429 = sbr.rel (!%p427_p1) target bundleno = 50 (0x32), region = 123  ;;  %v1480_v36 = vmax.f32 (%p427_p1), %v1479_v19, 1e-12  ;;  %s1518_s14 = sadd.s32 (%p427_p1), %s1801_s30, %s2163_s15 }
 0x301   : > { %s1519_s29 = scalar_lea.hbm (%p427_p1), %s2672_s9, %s1518_s14  ;;  %s1498_s15 = scalar_lea.sflag (%p427_p1), [#allocation6], %s375_s16 }
 0x302   : > { %1909 = vrcp.f32 (%p427_p1), %v1480_v36  ;;  %v1492_v16 = vand.u32 (%p427_p1), 2147483648, %v1480_v36  ;;  %vm1486_vm7 = vweird.f32 (%p427_p1), %v1480_v36  ;;  %v1490_v50 = vand.u32 (%p427_p1), 2147483647, %v1480_v36  ;;  %s1523_s11 = sshll.u32 (%p427_p1), %s1519_s29, 4  ;;  %s1943_s25 = scalar_lea.hbm (%p427_p1), %s2672_s9, 16  ;;  %s1524_s11 = int_to_ptr.hbm [resolvable:$true] %s1523_s11 }
 0x303   : > { %v1478_v21 = vld [vmem:[%s2199_s26] sm:$0xf] (%p427_p1)  ;;  %s1937_s20 = sshra.s32 (%p427_p1), %s1524_s11, 4  ;;  %s1938_s20 = int_to_ptr.hbm [resolvable:$true] %s1937_s20 }
 0x304   : > { %v1493_v20 = vor.u32 (%p427_p1), 1.1754944e-38, %v1492_v16  ;;  %vm1491_vm10 = vcmp.eq.f32.partialorder (%p427_p1), %v1490_v50, 8.507059e+37  ;;  %s1939_s12 = scalar_lea.hbm (%p427_p1), %s1938_s20, 4  ;;  %p1944_p6 = scmp.lt.s32.totalorder (%p427_p1), %s1938_s20, %s2672_s9 }
 0x305   : > { %p1940_p2 = scmp.ne.s32.totalorder %s1938_s20, %s1939_s12  ;;  %p1945_p7 = scmp.lt.s32.totalorder %s1943_s25, %s1939_s12 }
 0x307   : > { %p1941_p4 = pnand %p1940_p2, %p2142_p3  ;;  %p1946_p9 = por %p1945_p7, %p1944_p6 }
 0x308   : > { %v1910_v31 = vpop.eup %1909 }
 0x309   : > { %v1482_v32 = vmul.f32 %v1910_v31, %v1480_v36  ;;  %vm1487_vm8 = vweird.f32 %v1910_v31  ;;  %p1942_p5 = pneg %p1941_p4 }
 0x30a   : > { %vm1488_vm9 = vmor %vm1486_vm7, %vm1487_vm8 }
 0x30b   : > { %v1483_v17 = vsub.f32 1.0, %v1482_v32  ;;  %p1947_p10 = pnand %p1946_p9, %p1942_p5 }
 0x30d   : > { %v1484_v53 = vmul.f32 %v1910_v31, %v1483_v17 }
 0x30f   : > { %v1485_v37 = vadd.f32 %v1910_v31, %v1484_v53 }
 0x311   : > { %v1489_v33 = vsel %vm1488_vm9, %v1910_v31, %v1485_v37 }
 0x312   : > { %v1494_v52 = vsel %vm1491_vm10, %v1493_v20, %v1489_v33 }
 0x313   : > { %v1495_v40 = vmul.f32 %v1494_v52, %v1478_v21 }
 0x315   : > { %1496 = vst.msk [vmem:[%s2199_s26] sm:$0xf] %vm2169_vm0, %v1495_v40 }
 0x316   : > { %1950 = shalt.err (!%p1947_p10)
}
 0x317   : > { %1806 = dma.vmem_to_hbm [thread:$0]  (%p2142_p3), %s1522_s28, 64, %s1524_s11, %s1498_s15  }
 0x318 PF: > { %s2746_s16 = sld [smem:[#allocation13_spill]] }
 0x319   : > { %s2747_s26 = sld [smem:[#allocation9_spill]] }
 0x31e   : > { %p1812_p11 = scmp.ge.s32.totalorder %s2746_s16, 2 }
 0x31f   : > { %s1539_s27 = sand.u32 1, %s2747_s26  }
 0x320   : > { %p1809_p12 = pnand %p1812_p11, %p2151_p8  ;;  %s1540_s30 = scalar_lea.sflag [#allocation6], %s1539_s27 }
 0x322   : > { %p1810_p13 = pneg %p1809_p12 }
 0x324   : > { %1990 = dma.done.wait (%p1810_p13), %s1540_s30, 64  }
 0x325   : > { %1992 = vsyncadd (%p1810_p13), %s1540_s30, 4294967232  ;;  %s32_s23 = sadd.s32 1, %s2746_s16   ;;  %s2749_s14 = sld [smem:[#allocation10_spill]] }
 0x326   : > { %p29_p0 = scmp.ge.s32.totalorder %s32_s23, 6   ;;  %s2750_s19 = sld [smem:[#allocation18_spill]] }
 0x327   : > { %s2751_s20 = sld [smem:[#allocation11_spill]]  ;;  %s2755_s17 = smov %s1999_s18 }
 0x328   : > { %s2752_s21 = sld [smem:[#allocation12_spill]]  ;;  %31 = sbr.rel (!%p29_p0) target bundleno = 11 (0xb), region = 134 }
 0x329   : > { %s2753_s22 = sld [smem:[#allocation14_spill]] }
 0x32a   : > { %s2754_s0 = sld [smem:[#allocation16_spill]] }
 0x32b   : > { %s2756_s18 = smov %s2749_s14 }
 0x32d   :  { %1558 = vsyncpa [#allocation6], 1 }
 0x32e   :  { %1560 = vsyncpa [#allocation6 + $0x1], 1 }

</bundles_post_ra>
